<compile_context>
chip_gen: v7x
topology: tpu7x:2x2x1
jax: 0.10.0
libtpu: 0.0.40
codegen_flags: <defaults>
</compile_context>

<pallas_src>
import functools

import numpy as np
import jax
import jax.numpy as jnp
from jax.experimental import pallas as pl
from jax.experimental.pallas import tpu as pltpu


_VMEM_LIMIT = 48 * 1024 * 1024   # safe under v7x's 64 MiB physical VMEM


def snr_to_noise(snr):
    snr_lin = 10.0 ** (snr / 10.0)
    return 1.0 / np.sqrt(2.0 * snr_lin)


def _pick_strip_rows(h, cap=64):
    """Largest divisor of h that is <= cap and (if possible) gives >= 2 strips."""
    divs = [r for r in range(1, h + 1) if h % r == 0 and r <= cap]
    if not divs:
        return h
    multi = [r for r in divs if h // r >= 2]
    return max(multi) if multi else max(divs)


# -------- Pallas kernel 1: stride-2 direct conv (phase slabs) + bias + PReLU --

def _conv1_s2_kernel(x_ref, w_ref, b_ref, al_ref, o_ref, sum_ref, *, L, Wph, taps):
    # x:   (1, 4, Lp, Cin) bf16 -- the 4 stride-2 phase slabs, flattened + slack
    # w:   (9, Cin, Cout)  bf16 ; b/alpha: (1, Cout) f32
    # o:   (1, L, Cout)    bf16 with L = Hout*Wph (col Wph-1 of each row garbage)
    # sum: (1, 1, Cout)    f32  -- spatial sum over VALID columns (AF pool)
    cout = o_ref.shape[-1]
    xs = [x_ref[0, p] for p in range(4)]                  # 4 x (Lp, Cin) bf16
    acc = jnp.zeros((L, cout), jnp.float32)
    for t, (p, off) in enumerate(taps):                   # 9 static row shifts
        acc = acc + jnp.dot(xs[p][off:off + L, :], w_ref[t],
                            preferred_element_type=jnp.float32)
    acc = acc + b_ref[...]
    y = jnp.maximum(acc, 0.0) + al_ref[...] * jnp.minimum(acc, 0.0)
    o_ref[0] = y.astype(o_ref.dtype)
    col = jax.lax.broadcasted_iota(jnp.int32, (L, 1), 0) % Wph
    sum_ref[0] = jnp.sum(jnp.where(col < Wph - 1, y, 0.0), axis=0, keepdims=True)


def conv1_s2_prelu(phases, w, bias, alpha, *, L, Wph, taps):
    B, NP, Lp, Cin = phases.shape
    Cout = w.shape[-1]
    kern = functools.partial(_conv1_s2_kernel, L=L, Wph=Wph, taps=taps)
    return pl.pallas_call(
        kern,
        out_shape=(jax.ShapeDtypeStruct((B, L, Cout), jnp.bfloat16),
                   jax.ShapeDtypeStruct((B, 1, Cout), jnp.float32)),
        grid_spec=pltpu.PrefetchScalarGridSpec(
            num_scalar_prefetch=0,
            grid=(B,),
            in_specs=[
                pl.BlockSpec((1, NP, Lp, Cin), lambda b: (b, 0, 0, 0)),
                pl.BlockSpec((9, Cin, Cout), lambda b: (0, 0, 0)),
                pl.BlockSpec((1, Cout), lambda b: (0, 0)),
                pl.BlockSpec((1, Cout), lambda b: (0, 0)),
            ],
            out_specs=[
                pl.BlockSpec((1, L, Cout), lambda b: (b, 0, 0)),
                pl.BlockSpec((1, 1, Cout), lambda b: (b, 0, 0)),
            ],
        ),
        compiler_params=pltpu.CompilerParams(
            dimension_semantics=("parallel",),
            vmem_limit_bytes=_VMEM_LIMIT),
    )(phases, w, bias, alpha)


# -------- Pallas kernel 2: stride-1 direct conv on row strips + bias + PReLU --
# (the per-(batch,channel) AF gate is pre-folded into the bf16 weights)

def _conv2_s1_kernel(x_ref, w_ref, b_ref, al_ref, o_ref, *, L, Wp):
    # x: (1, 1, Lp, C) bf16 -- one padded row-strip (2-row halo), flattened
    # w: (1, 9, C, Cout) bf16 -- per-batch weights with the AF gate folded in
    # b/alpha: (1, Cout) f32 ; o: (1, 1, L, Cout) bf16 with L = strip_rows*Wp
    cout = o_ref.shape[-1]
    x = x_ref[0, 0]                                       # (Lp, C) bf16
    acc = jnp.zeros((L, cout), jnp.float32)
    for k in range(9):                                    # 9 static row shifts
        off = (k // 3) * Wp + (k % 3)
        acc = acc + jnp.dot(x[off:off + L, :], w_ref[0, k],
                            preferred_element_type=jnp.float32)
    acc = acc + b_ref[...]
    o_ref[0, 0] = (jnp.maximum(acc, 0.0)
                   + al_ref[...] * jnp.minimum(acc, 0.0)).astype(o_ref.dtype)


def conv2_s1_prelu(strips, w, bias, alpha, *, L, Wp):
    B, NS, Lp, C = strips.shape
    Cout = w.shape[-1]
    kern = functools.partial(_conv2_s1_kernel, L=L, Wp=Wp)
    return pl.pallas_call(
        kern,
        out_shape=jax.ShapeDtypeStruct((B, NS, L, Cout), jnp.bfloat16),
        grid_spec=pltpu.PrefetchScalarGridSpec(
            num_scalar_prefetch=0,
            grid=(B, NS),
            in_specs=[
                pl.BlockSpec((1, 1, Lp, C), lambda b, s: (b, s, 0, 0)),
                pl.BlockSpec((1, 9, C, Cout), lambda b, s: (b, 0, 0, 0)),
                pl.BlockSpec((1, Cout), lambda b, s: (0, 0)),
                pl.BlockSpec((1, Cout), lambda b, s: (0, 0)),
            ],
            out_specs=pl.BlockSpec((1, 1, L, Cout), lambda b, s: (b, s, 0, 0)),
        ),
        compiler_params=pltpu.CompilerParams(
            dimension_semantics=("parallel", "parallel"),
            vmem_limit_bytes=_VMEM_LIMIT),
    )(strips, w, bias, alpha)


# ----------------------------- JAX glue (Conv2.forward) ----------------------

@functools.partial(jax.jit, static_argnames=("n_var",))
def conv2_forward(x_nchw, params, *, n_var):
    """Conv2.forward: conv1(s=2)+PReLU -> AF_Module -> conv2(s=1)+PReLU."""
    x = jnp.transpose(x_nchw, (0, 2, 3, 1)).astype(jnp.bfloat16)   # NHWC bf16
    B, H, W, Cin = x.shape
    assert H % 2 == 0 and W % 2 == 0, "stride-2 phase split assumes even H, W"

    w1, b1, a1 = params["w1"], params["b1"], params["a1"]
    Cout = w1.shape[0]
    Hout, Wout = H // 2, W // 2               # (H + 2 - 3)//2 + 1 for even H
    Hph, Wph = Hout + 1, Wout + 1
    slack = 8

    # ---- conv1 + PReLU: direct stride-2 conv over 4 space-to-depth phases ---
    xp = jnp.pad(x, ((0, 0), (1, 1), (1, 1), (0, 0)))              # (B,H+2,W+2,Cin)
    phases = [xp[:, r::2, c::2, :].reshape(B, Hph * Wph, Cin)
              for r in (0, 1) for c in (0, 1)]
    ph = jnp.stack(phases, axis=1)                                 # (B,4,Hph*Wph,Cin)
    ph = jnp.pad(ph, ((0, 0), (0, 0), (0, slack), (0, 0)))         # + slack rows
    L1 = Hout * Wph
    taps = tuple(((ky % 2) * 2 + (kx % 2), (ky // 2) * Wph + (kx // 2))
                 for ky in range(3) for kx in range(3))
    w1m = jnp.transpose(w1, (2, 3, 1, 0)).reshape(9, Cin, Cout).astype(jnp.bfloat16)
    b1v = b1.reshape(1, Cout).astype(jnp.float32)
    a1v = a1.reshape(1, Cout).astype(jnp.float32)
    h_flat, h_sum = conv1_s2_prelu(ph, w1m, b1v, a1v, L=L1, Wph=Wph, taps=taps)
    # h_flat: (B, Hout*Wph, Cout) bf16 (col Wout garbage); h_sum: (B,1,Cout) f32

    # ---- AF_Module: [noise, gap(h)] -> 1x1 conv -> ReLU -> 1x1 conv -> sigmoid
    noise = snr_to_noise(n_var)
    pooled = h_sum[:, 0, :] * (1.0 / float(Hout * Wout))           # (B, Cout) f32
    z = jnp.concatenate(
        [jnp.full((B, 1), noise, dtype=jnp.float32), pooled], axis=1)
    z = jnp.maximum(z @ params["w_se1"].T + params["b_se1"], 0.0)
    gate = jax.nn.sigmoid(z @ params["w_se2"].T + params["b_se2"])  # (B, Cout)
    # (x2 = h * gate is folded into conv2's weights: conv is linear in x)

    # ---- conv2 + PReLU: direct conv over row strips with a 2-row halo -------
    w2, b2, a2 = params["w2"], params["b2"], params["a2"]
    C2out = w2.shape[0]
    Wp2 = Wout + 2
    h_img = h_flat.reshape(B, Hout, Wph, Cout)                     # free reshape
    xpad2 = jnp.pad(h_img[:, :, :Wout, :],
                    ((0, 0), (1, 1), (1, 1), (0, 0)))              # (B,Hout+2,Wp2,C)
    R = _pick_strip_rows(Hout)
    NS = Hout // R
    strips = jnp.stack([xpad2[:, s * R: s * R + R + 2] for s in range(NS)],
                       axis=1)                                     # (B,NS,R+2,Wp2,C)
    strips = strips.reshape(B, NS, (R + 2) * Wp2, Cout)
    strips = jnp.pad(strips, ((0, 0), (0, 0), (0, slack), (0, 0)))
    L2 = R * Wp2
    w2r = jnp.transpose(w2, (2, 3, 1, 0)).reshape(9, Cout, C2out)
    w2s = (w2r[None] * gate[:, None, :, None]).astype(jnp.bfloat16)  # (B,9,C,Cout)
    b2v = b2.reshape(1, C2out).astype(jnp.float32)
    a2v = a2.reshape(1, C2out).astype(jnp.float32)
    out_flat = conv2_s1_prelu(strips, w2s, b2v, a2v, L=L2, Wp=Wp2)
    out = out_flat.reshape(B, Hout, Wp2, C2out)[:, :, :Wout, :]    # drop garbage cols
    return jnp.transpose(out, (0, 3, 1, 2))                        # NHWC -> NCHW (bf16)


# ----------------------------- pure-JAX reference ----------------------------

def _ref_forward(x_nchw, n_var, params):
    x = x_nchw.astype(jnp.float32)
    y = jax.lax.conv_general_dilated(
        x, params["w1"], window_strides=(2, 2), padding=((1, 1), (1, 1)),
        dimension_numbers=("NCHW", "OIHW", "NCHW"))
    y = y + params["b1"][None, :, None, None]
    a1 = params["a1"][None, :, None, None]
    y = jnp.maximum(y, 0.0) + a1 * jnp.minimum(y, 0.0)
    noise = snr_to_noise(n_var)
    pooled = jnp.mean(y, axis=(2, 3))
    z = jnp.concatenate(
        [jnp.full((y.shape[0], 1), noise, jnp.float32), pooled], axis=1)
    z = jnp.maximum(z @ params["w_se1"].T + params["b_se1"], 0.0)
    gate = jax.nn.sigmoid(z @ params["w_se2"].T + params["b_se2"])
    y = y * gate[:, :, None, None]
    y2 = jax.lax.conv_general_dilated(
        y, params["w2"], window_strides=(1, 1), padding=((1, 1), (1, 1)),
        dimension_numbers=("NCHW", "OIHW", "NCHW"))
    y2 = y2 + params["b2"][None, :, None, None]
    a2 = params["a2"][None, :, None, None]
    return jnp.maximum(y2, 0.0) + a2 * jnp.minimum(y2, 0.0)


# ----------------------------------- demo ------------------------------------

if __name__ == "__main__":
    in_planes, out_planes = 4, 16
    B, H, W = 2, 16, 16
    hidden = int(out_planes / 8)
    n_var = 10.0   # SNR in dB (the "n_var" argument of Conv2.forward)

    key = jax.random.PRNGKey(0)
    keys = jax.random.split(key, 10)
    x = jax.random.normal(keys[0], (B, in_planes, H, W), dtype=jnp.float32)

    params = {
        # conv1: Conv2d(in_planes, out_planes, 3, stride=2, pad=1) + PReLU
        "w1": 0.1 * jax.random.normal(keys[1], (out_planes, in_planes, 3, 3), jnp.float32),
        "b1": 0.1 * jax.random.normal(keys[2], (out_planes,), jnp.float32),
        "a1": jnp.full((out_planes,), 0.25, jnp.float32),
        # AF_Module SE: Conv2d(C+1, C/8, 1) -> ReLU -> Conv2d(C/8, C, 1) -> Sigmoid
        "w_se1": 0.1 * jax.random.normal(keys[3], (hidden, out_planes + 1), jnp.float32),
        "b_se1": 0.1 * jax.random.normal(keys[4], (hidden,), jnp.float32),
        "w_se2": 0.1 * jax.random.normal(keys[5], (out_planes, hidden), jnp.float32),
        "b_se2": 0.1 * jax.random.normal(keys[6], (out_planes,), jnp.float32),
        # conv2: Conv2d(out_planes, out_planes, 3, stride=1, pad=1) + PReLU
        "w2": 0.1 * jax.random.normal(keys[7], (out_planes, out_planes, 3, 3), jnp.float32),
        "b2": 0.1 * jax.random.normal(keys[8], (out_planes,), jnp.float32),
        "a2": jnp.full((out_planes,), 0.25, jnp.float32),
    }

    out = conv2_forward(x, params, n_var=n_var)
    out = jax.block_until_ready(out)
    assert out.shape == (B, out_planes, H // 2, W // 2), out.shape
    assert bool(jnp.all(jnp.isfinite(out)))

    ref = jax.block_until_ready(_ref_forward(x, n_var, params))
    err = float(jnp.max(jnp.abs(out.astype(jnp.float32) - ref)))
    assert np.isfinite(err) and err < 2e-1, err

    print("KERNEL_OK")
</pallas_src>

<mosaic_0001>
module attributes {stable_mosaic.version = 11 : i64} {
  func.func @_conv1_s2_kernel(%arg0: i32, %arg1: memref<1x4x89x4xbf16, #tpu.memory_space<vmem>>, %arg2: memref<9x4x16xbf16, #tpu.memory_space<vmem>>, %arg3: memref<1x16xf32, #tpu.memory_space<vmem>>, %arg4: memref<1x16xf32, #tpu.memory_space<vmem>>, %arg5: memref<1x72x16xbf16, #tpu.memory_space<vmem>>, %arg6: memref<1x1x16xf32, #tpu.memory_space<vmem>>) attributes {dimension_semantics = [#tpu.dimension_semantics<parallel>], iteration_bounds = array<i64: 2>, scalar_prefetch = 0 : i64, scratch_operands = 0 : i64, tpu.core_type = #tpu.core_type<tc>, window_params = [{transform_indices = @transform_0, window_bounds = array<i64: 1, 4, 89, 4>}, {pipeline_mode = #tpu.pipeline_mode<synchronous>, transform_indices = @transform_1, window_bounds = array<i64: 9, 4, 16>}, {pipeline_mode = #tpu.pipeline_mode<synchronous>, transform_indices = @transform_2, window_bounds = array<i64: 1, 16>}, {pipeline_mode = #tpu.pipeline_mode<synchronous>, transform_indices = @transform_3, window_bounds = array<i64: 1, 16>}, {transform_indices = @transform_4, window_bounds = array<i64: 1, 72, 16>}, {transform_indices = @transform_5, window_bounds = array<i64: 1, 1, 16>}]} {
    %c0 = arith.constant 0 : index
    %c0_0 = arith.constant 0 : index
    %c0_1 = arith.constant 0 : index
    %c0_2 = arith.constant 0 : index
    %0 = vector.load %arg1[%c0, %c0_0, %c0_1, %c0_2] : memref<1x4x89x4xbf16, #tpu.memory_space<vmem>>, vector<1x1x89x4xbf16>
    %1 = vector.shape_cast %0 : vector<1x1x89x4xbf16> to vector<89x4xbf16>
    %c0_3 = arith.constant 0 : index
    %c1 = arith.constant 1 : index
    %c0_4 = arith.constant 0 : index
    %c0_5 = arith.constant 0 : index
    %2 = vector.load %arg1[%c0_3, %c1, %c0_4, %c0_5] : memref<1x4x89x4xbf16, #tpu.memory_space<vmem>>, vector<1x1x89x4xbf16>
    %3 = vector.shape_cast %2 : vector<1x1x89x4xbf16> to vector<89x4xbf16>
    %c0_6 = arith.constant 0 : index
    %c2 = arith.constant 2 : index
    %c0_7 = arith.constant 0 : index
    %c0_8 = arith.constant 0 : index
    %4 = vector.load %arg1[%c0_6, %c2, %c0_7, %c0_8] : memref<1x4x89x4xbf16, #tpu.memory_space<vmem>>, vector<1x1x89x4xbf16>
    %5 = vector.shape_cast %4 : vector<1x1x89x4xbf16> to vector<89x4xbf16>
    %c0_9 = arith.constant 0 : index
    %c3 = arith.constant 3 : index
    %c0_10 = arith.constant 0 : index
    %c0_11 = arith.constant 0 : index
    %6 = vector.load %arg1[%c0_9, %c3, %c0_10, %c0_11] : memref<1x4x89x4xbf16, #tpu.memory_space<vmem>>, vector<1x1x89x4xbf16>
    %7 = vector.shape_cast %6 : vector<1x1x89x4xbf16> to vector<89x4xbf16>
    %cst = arith.constant 0.000000e+00 : f32
    %8 = vector.broadcast %cst : f32 to vector<72x16xf32>
    %9 = vector.extract_strided_slice %1 {offsets = [0, 0], sizes = [72, 4], strides = [1, 1]} : vector<89x4xbf16> to vector<72x4xbf16>
    %c0_12 = arith.constant 0 : index
    %c0_13 = arith.constant 0 : index
    %c0_14 = arith.constant 0 : index
    %10 = vector.load %arg2[%c0_12, %c0_13, %c0_14] : memref<9x4x16xbf16, #tpu.memory_space<vmem>>, vector<1x4x16xbf16>
    %11 = vector.shape_cast %10 : vector<1x4x16xbf16> to vector<4x16xbf16>
    %cst_15 = arith.constant dense<0.000000e+00> : vector<72x16xf32>
    %12 = tpu.matmul %9, %11, %cst_15 {dimension_numbers = #tpu.dot_dimension_numbers<[1], [0], [0], [1], [0, 0, 1, 1], [], []>} : vector<72x4xbf16>, vector<4x16xbf16>, vector<72x16xf32> -> vector<72x16xf32>
    %13 = arith.addf %8, %12 : vector<72x16xf32>
    %14 = vector.extract_strided_slice %3 {offsets = [0, 0], sizes = [72, 4], strides = [1, 1]} : vector<89x4xbf16> to vector<72x4xbf16>
    %c1_16 = arith.constant 1 : index
    %c0_17 = arith.constant 0 : index
    %c0_18 = arith.constant 0 : index
    %15 = vector.load %arg2[%c1_16, %c0_17, %c0_18] : memref<9x4x16xbf16, #tpu.memory_space<vmem>>, vector<1x4x16xbf16>
    %16 = vector.shape_cast %15 : vector<1x4x16xbf16> to vector<4x16xbf16>
    %cst_19 = arith.constant dense<0.000000e+00> : vector<72x16xf32>
    %17 = tpu.matmul %14, %16, %cst_19 {dimension_numbers = #tpu.dot_dimension_numbers<[1], [0], [0], [1], [0, 0, 1, 1], [], []>} : vector<72x4xbf16>, vector<4x16xbf16>, vector<72x16xf32> -> vector<72x16xf32>
    %18 = arith.addf %13, %17 : vector<72x16xf32>
    %19 = vector.extract_strided_slice %1 {offsets = [1, 0], sizes = [72, 4], strides = [1, 1]} : vector<89x4xbf16> to vector<72x4xbf16>
    %c2_20 = arith.constant 2 : index
    %c0_21 = arith.constant 0 : index
    %c0_22 = arith.constant 0 : index
    %20 = vector.load %arg2[%c2_20, %c0_21, %c0_22] : memref<9x4x16xbf16, #tpu.memory_space<vmem>>, vector<1x4x16xbf16>
    %21 = vector.shape_cast %20 : vector<1x4x16xbf16> to vector<4x16xbf16>
    %cst_23 = arith.constant dense<0.000000e+00> : vector<72x16xf32>
    %22 = tpu.matmul %19, %21, %cst_23 {dimension_numbers = #tpu.dot_dimension_numbers<[1], [0], [0], [1], [0, 0, 1, 1], [], []>} : vector<72x4xbf16>, vector<4x16xbf16>, vector<72x16xf32> -> vector<72x16xf32>
    %23 = arith.addf %18, %22 : vector<72x16xf32>
    %24 = vector.extract_strided_slice %5 {offsets = [0, 0], sizes = [72, 4], strides = [1, 1]} : vector<89x4xbf16> to vector<72x4xbf16>
    %c3_24 = arith.constant 3 : index
    %c0_25 = arith.constant 0 : index
    %c0_26 = arith.constant 0 : index
    %25 = vector.load %arg2[%c3_24, %c0_25, %c0_26] : memref<9x4x16xbf16, #tpu.memory_space<vmem>>, vector<1x4x16xbf16>
    %26 = vector.shape_cast %25 : vector<1x4x16xbf16> to vector<4x16xbf16>
    %cst_27 = arith.constant dense<0.000000e+00> : vector<72x16xf32>
    %27 = tpu.matmul %24, %26, %cst_27 {dimension_numbers = #tpu.dot_dimension_numbers<[1], [0], [0], [1], [0, 0, 1, 1], [], []>} : vector<72x4xbf16>, vector<4x16xbf16>, vector<72x16xf32> -> vector<72x16xf32>
    %28 = arith.addf %23, %27 : vector<72x16xf32>
    %29 = vector.extract_strided_slice %7 {offsets = [0, 0], sizes = [72, 4], strides = [1, 1]} : vector<89x4xbf16> to vector<72x4xbf16>
    %c4 = arith.constant 4 : index
    %c0_28 = arith.constant 0 : index
    %c0_29 = arith.constant 0 : index
    %30 = vector.load %arg2[%c4, %c0_28, %c0_29] : memref<9x4x16xbf16, #tpu.memory_space<vmem>>, vector<1x4x16xbf16>
    %31 = vector.shape_cast %30 : vector<1x4x16xbf16> to vector<4x16xbf16>
    %cst_30 = arith.constant dense<0.000000e+00> : vector<72x16xf32>
    %32 = tpu.matmul %29, %31, %cst_30 {dimension_numbers = #tpu.dot_dimension_numbers<[1], [0], [0], [1], [0, 0, 1, 1], [], []>} : vector<72x4xbf16>, vector<4x16xbf16>, vector<72x16xf32> -> vector<72x16xf32>
    %33 = arith.addf %28, %32 : vector<72x16xf32>
    %34 = vector.extract_strided_slice %5 {offsets = [1, 0], sizes = [72, 4], strides = [1, 1]} : vector<89x4xbf16> to vector<72x4xbf16>
    %c5 = arith.constant 5 : index
    %c0_31 = arith.constant 0 : index
    %c0_32 = arith.constant 0 : index
    %35 = vector.load %arg2[%c5, %c0_31, %c0_32] : memref<9x4x16xbf16, #tpu.memory_space<vmem>>, vector<1x4x16xbf16>
    %36 = vector.shape_cast %35 : vector<1x4x16xbf16> to vector<4x16xbf16>
    %cst_33 = arith.constant dense<0.000000e+00> : vector<72x16xf32>
    %37 = tpu.matmul %34, %36, %cst_33 {dimension_numbers = #tpu.dot_dimension_numbers<[1], [0], [0], [1], [0, 0, 1, 1], [], []>} : vector<72x4xbf16>, vector<4x16xbf16>, vector<72x16xf32> -> vector<72x16xf32>
    %38 = arith.addf %33, %37 : vector<72x16xf32>
    %39 = vector.extract_strided_slice %1 {offsets = [9, 0], sizes = [72, 4], strides = [1, 1]} : vector<89x4xbf16> to vector<72x4xbf16>
    %c6 = arith.constant 6 : index
    %c0_34 = arith.constant 0 : index
    %c0_35 = arith.constant 0 : index
    %40 = vector.load %arg2[%c6, %c0_34, %c0_35] : memref<9x4x16xbf16, #tpu.memory_space<vmem>>, vector<1x4x16xbf16>
    %41 = vector.shape_cast %40 : vector<1x4x16xbf16> to vector<4x16xbf16>
    %cst_36 = arith.constant dense<0.000000e+00> : vector<72x16xf32>
    %42 = tpu.matmul %39, %41, %cst_36 {dimension_numbers = #tpu.dot_dimension_numbers<[1], [0], [0], [1], [0, 0, 1, 1], [], []>} : vector<72x4xbf16>, vector<4x16xbf16>, vector<72x16xf32> -> vector<72x16xf32>
    %43 = arith.addf %38, %42 : vector<72x16xf32>
    %44 = vector.extract_strided_slice %3 {offsets = [9, 0], sizes = [72, 4], strides = [1, 1]} : vector<89x4xbf16> to vector<72x4xbf16>
    %c7 = arith.constant 7 : index
    %c0_37 = arith.constant 0 : index
    %c0_38 = arith.constant 0 : index
    %45 = vector.load %arg2[%c7, %c0_37, %c0_38] : memref<9x4x16xbf16, #tpu.memory_space<vmem>>, vector<1x4x16xbf16>
    %46 = vector.shape_cast %45 : vector<1x4x16xbf16> to vector<4x16xbf16>
    %cst_39 = arith.constant dense<0.000000e+00> : vector<72x16xf32>
    %47 = tpu.matmul %44, %46, %cst_39 {dimension_numbers = #tpu.dot_dimension_numbers<[1], [0], [0], [1], [0, 0, 1, 1], [], []>} : vector<72x4xbf16>, vector<4x16xbf16>, vector<72x16xf32> -> vector<72x16xf32>
    %48 = arith.addf %43, %47 : vector<72x16xf32>
    %49 = vector.extract_strided_slice %1 {offsets = [10, 0], sizes = [72, 4], strides = [1, 1]} : vector<89x4xbf16> to vector<72x4xbf16>
    %c8 = arith.constant 8 : index
    %c0_40 = arith.constant 0 : index
    %c0_41 = arith.constant 0 : index
    %50 = vector.load %arg2[%c8, %c0_40, %c0_41] : memref<9x4x16xbf16, #tpu.memory_space<vmem>>, vector<1x4x16xbf16>
    %51 = vector.shape_cast %50 : vector<1x4x16xbf16> to vector<4x16xbf16>
    %cst_42 = arith.constant dense<0.000000e+00> : vector<72x16xf32>
    %52 = tpu.matmul %49, %51, %cst_42 {dimension_numbers = #tpu.dot_dimension_numbers<[1], [0], [0], [1], [0, 0, 1, 1], [], []>} : vector<72x4xbf16>, vector<4x16xbf16>, vector<72x16xf32> -> vector<72x16xf32>
    %53 = arith.addf %48, %52 : vector<72x16xf32>
    %c0_43 = arith.constant 0 : index
    %c0_44 = arith.constant 0 : index
    %54 = vector.load %arg3[%c0_43, %c0_44] : memref<1x16xf32, #tpu.memory_space<vmem>>, vector<1x16xf32>
    %55 = vector.broadcast %54 : vector<1x16xf32> to vector<72x16xf32>
    %56 = arith.addf %53, %55 : vector<72x16xf32>
    %cst_45 = arith.constant 0.000000e+00 : f32
    %57 = vector.broadcast %cst_45 : f32 to vector<72x16xf32>
    %58 = arith.maximumf %56, %57 : vector<72x16xf32>
    %c0_46 = arith.constant 0 : index
    %c0_47 = arith.constant 0 : index
    %59 = vector.load %arg4[%c0_46, %c0_47] : memref<1x16xf32, #tpu.memory_space<vmem>>, vector<1x16xf32>
    %cst_48 = arith.constant 0.000000e+00 : f32
    %60 = vector.broadcast %cst_48 : f32 to vector<72x16xf32>
    %61 = arith.minimumf %56, %60 : vector<72x16xf32>
    %62 = vector.broadcast %59 : vector<1x16xf32> to vector<72x16xf32>
    %63 = arith.mulf %62, %61 : vector<72x16xf32>
    %64 = arith.addf %58, %63 : vector<72x16xf32>
    %65 = arith.truncf %64 : vector<72x16xf32> to vector<72x16xbf16>
    %c0_49 = arith.constant 0 : index
    %c0_50 = arith.constant 0 : index
    %c0_51 = arith.constant 0 : index
    %66 = vector.load %arg5[%c0_49, %c0_50, %c0_51] : memref<1x72x16xbf16, #tpu.memory_space<vmem>>, vector<1x72x16xbf16>
    %67 = vector.shape_cast %66 : vector<1x72x16xbf16> to vector<72x16xbf16>
    %68 = vector.shape_cast %65 : vector<72x16xbf16> to vector<1x72x16xbf16>
    tpu.vector_store %arg5[%c0_49, %c0_50, %c0_51], %68 {strides = array<i32>} : memref<1x72x16xbf16, #tpu.memory_space<vmem>>, vector<1x72x16xbf16>,
    %69 = tpu.iota {dimensions = array<i32: 0>} : vector<72x1xi32>
    %c9_i32 = arith.constant 9 : i32
    %c0_i32 = arith.constant 0 : i32
    %70 = arith.cmpi eq, %c9_i32, %c0_i32 : i32
    %c1_i32 = arith.constant 1 : i32
    %71 = arith.select %70, %c1_i32, %c9_i32 : i32
    %72 = vector.broadcast %71 : i32 to vector<72x1xi32>
    %73 = arith.remsi %69, %72 : vector<72x1xi32>
    %c0_i32_52 = arith.constant 0 : i32
    %74 = vector.broadcast %c0_i32_52 : i32 to vector<72x1xi32>
    %75 = arith.cmpi ne, %73, %74 : vector<72x1xi32>
    %c0_i32_53 = arith.constant 0 : i32
    %76 = vector.broadcast %c0_i32_53 : i32 to vector<72x1xi32>
    %77 = arith.cmpi slt, %73, %76 : vector<72x1xi32>
    %c0_i32_54 = arith.constant 0 : i32
    %78 = arith.cmpi slt, %71, %c0_i32_54 : i32
    %79 = vector.broadcast %78 : i1 to vector<72x1xi1>
    %80 = vector.broadcast %79 : vector<72x1xi1> to vector<72x1xi1>
    %81 = arith.xori %77, %80 : vector<72x1xi1>
    %82 = arith.andi %81, %75 : vector<72x1xi1>
    %83 = vector.broadcast %71 : i32 to vector<72x1xi32>
    %84 = arith.addi %73, %83 : vector<72x1xi32>
    %85 = arith.select %82, %84, %73 : vector<72x1xi1>, vector<72x1xi32>
    %c8_i32 = arith.constant 8 : i32
    %86 = vector.broadcast %c8_i32 : i32 to vector<72x1xi32>
    %87 = arith.cmpi slt, %85, %86 : vector<72x1xi32>
    %cst_55 = arith.constant 0.000000e+00 : f32
    %88 = vector.shape_cast %87 : vector<72x1xi1> to vector<72x1xi1>
    %89 = vector.broadcast %88 : vector<72x1xi1> to vector<72x16xi1>
    %90 = vector.broadcast %cst_55 : f32 to vector<72x16xf32>
    %91 = arith.select %89, %64, %90 : vector<72x16xi1>, vector<72x16xf32>
    %cst_56 = arith.constant dense<0.000000e+00> : vector<16xf32>
    %92 = vector.multi_reduction <add>, %91, %cst_56 [0] : vector<72x16xf32> to vector<16xf32>
    %93 = vector.shape_cast %92 : vector<16xf32> to vector<1x16xf32>
    %c0_57 = arith.constant 0 : index
    %c0_58 = arith.constant 0 : index
    %c0_59 = arith.constant 0 : index
    %94 = vector.load %arg6[%c0_57, %c0_58, %c0_59] : memref<1x1x16xf32, #tpu.memory_space<vmem>>, vector<1x1x16xf32>
    %95 = vector.shape_cast %94 : vector<1x1x16xf32> to vector<1x16xf32>
    %96 = vector.shape_cast %93 : vector<1x16xf32> to vector<1x1x16xf32>
    tpu.vector_store %arg6[%c0_57, %c0_58, %c0_59], %96 {strides = array<i32>} : memref<1x1x16xf32, #tpu.memory_space<vmem>>, vector<1x1x16xf32>,
    return
  }
  func.func @transform_0(%arg0: i32) -> (i32, i32, i32, i32) {
    %c0_i32 = arith.constant 0 : i32
    %c0_i32_0 = arith.constant 0 : i32
    %c0_i32_1 = arith.constant 0 : i32
    %c0_i32_2 = arith.constant 0 : i32
    return %arg0, %c0_i32, %c0_i32_0, %c0_i32_1 : i32, i32, i32, i32
  }
  func.func @transform_1(%arg0: i32) -> (i32, i32, i32) {
    %c0_i32 = arith.constant 0 : i32
    %c0_i32_0 = arith.constant 0 : i32
    %c0_i32_1 = arith.constant 0 : i32
    %c0_i32_2 = arith.constant 0 : i32
    return %c0_i32, %c0_i32_0, %c0_i32_1 : i32, i32, i32
  }
  func.func @transform_2(%arg0: i32) -> (i32, i32) {
    %c0_i32 = arith.constant 0 : i32
    %c0_i32_0 = arith.constant 0 : i32
    %c0_i32_1 = arith.constant 0 : i32
    return %c0_i32, %c0_i32_0 : i32, i32
  }
  func.func @transform_3(%arg0: i32) -> (i32, i32) {
    %c0_i32 = arith.constant 0 : i32
    %c0_i32_0 = arith.constant 0 : i32
    %c0_i32_1 = arith.constant 0 : i32
    return %c0_i32, %c0_i32_0 : i32, i32
  }
  func.func @transform_4(%arg0: i32) -> (i32, i32, i32) {
    %c0_i32 = arith.constant 0 : i32
    %c0_i32_0 = arith.constant 0 : i32
    %c0_i32_1 = arith.constant 0 : i32
    return %arg0, %c0_i32, %c0_i32_0 : i32, i32, i32
  }
  func.func @transform_5(%arg0: i32) -> (i32, i32, i32) {
    %c0_i32 = arith.constant 0 : i32
    %c0_i32_0 = arith.constant 0 : i32
    %c0_i32_1 = arith.constant 0 : i32
    return %arg0, %c0_i32, %c0_i32_0 : i32, i32, i32
  }
}

module attributes {stable_mosaic.version = 11 : i64} {
  func.func @_conv2_s1_kernel(%arg0: i32, %arg1: i32, %arg2: memref<1x1x68x16xbf16, #tpu.memory_space<vmem>>, %arg3: memref<1x9x16x16xbf16, #tpu.memory_space<vmem>>, %arg4: memref<1x16xf32, #tpu.memory_space<vmem>>, %arg5: memref<1x16xf32, #tpu.memory_space<vmem>>, %arg6: memref<1x1x40x16xbf16, #tpu.memory_space<vmem>>) attributes {dimension_semantics = [#tpu.dimension_semantics<parallel>, #tpu.dimension_semantics<parallel>], iteration_bounds = array<i64: 2, 2>, scalar_prefetch = 0 : i64, scratch_operands = 0 : i64, tpu.core_type = #tpu.core_type<tc>, window_params = [{transform_indices = @transform_0, window_bounds = array<i64: 1, 1, 68, 16>}, {transform_indices = @transform_1, window_bounds = array<i64: 1, 9, 16, 16>}, {pipeline_mode = #tpu.pipeline_mode<synchronous>, transform_indices = @transform_2, window_bounds = array<i64: 1, 16>}, {pipeline_mode = #tpu.pipeline_mode<synchronous>, transform_indices = @transform_3, window_bounds = array<i64: 1, 16>}, {transform_indices = @transform_4, window_bounds = array<i64: 1, 1, 40, 16>}]} {
    %c0 = arith.constant 0 : index
    %c0_0 = arith.constant 0 : index
    %c0_1 = arith.constant 0 : index
    %c0_2 = arith.constant 0 : index
    %0 = vector.load %arg2[%c0, %c0_0, %c0_1, %c0_2] : memref<1x1x68x16xbf16, #tpu.memory_space<vmem>>, vector<1x1x68x16xbf16>
    %1 = vector.shape_cast %0 : vector<1x1x68x16xbf16> to vector<68x16xbf16>
    %cst = arith.constant 0.000000e+00 : f32
    %2 = vector.broadcast %cst : f32 to vector<40x16xf32>
    %3 = vector.extract_strided_slice %1 {offsets = [0, 0], sizes = [40, 16], strides = [1, 1]} : vector<68x16xbf16> to vector<40x16xbf16>
    %c0_3 = arith.constant 0 : index
    %c0_4 = arith.constant 0 : index
    %c0_5 = arith.constant 0 : index
    %c0_6 = arith.constant 0 : index
    %4 = vector.load %arg3[%c0_3, %c0_4, %c0_5, %c0_6] : memref<1x9x16x16xbf16, #tpu.memory_space<vmem>>, vector<1x1x16x16xbf16>
    %5 = vector.shape_cast %4 : vector<1x1x16x16xbf16> to vector<16x16xbf16>
    %cst_7 = arith.constant dense<0.000000e+00> : vector<40x16xf32>
    %6 = tpu.matmul %3, %5, %cst_7 {dimension_numbers = #tpu.dot_dimension_numbers<[1], [0], [0], [1], [0, 0, 1, 1], [], []>} : vector<40x16xbf16>, vector<16x16xbf16>, vector<40x16xf32> -> vector<40x16xf32>
    %7 = arith.addf %2, %6 : vector<40x16xf32>
    %8 = vector.extract_strided_slice %1 {offsets = [1, 0], sizes = [40, 16], strides = [1, 1]} : vector<68x16xbf16> to vector<40x16xbf16>
    %c0_8 = arith.constant 0 : index
    %c1 = arith.constant 1 : index
    %c0_9 = arith.constant 0 : index
    %c0_10 = arith.constant 0 : index
    %9 = vector.load %arg3[%c0_8, %c1, %c0_9, %c0_10] : memref<1x9x16x16xbf16, #tpu.memory_space<vmem>>, vector<1x1x16x16xbf16>
    %10 = vector.shape_cast %9 : vector<1x1x16x16xbf16> to vector<16x16xbf16>
    %cst_11 = arith.constant dense<0.000000e+00> : vector<40x16xf32>
    %11 = tpu.matmul %8, %10, %cst_11 {dimension_numbers = #tpu.dot_dimension_numbers<[1], [0], [0], [1], [0, 0, 1, 1], [], []>} : vector<40x16xbf16>, vector<16x16xbf16>, vector<40x16xf32> -> vector<40x16xf32>
    %12 = arith.addf %7, %11 : vector<40x16xf32>
    %13 = vector.extract_strided_slice %1 {offsets = [2, 0], sizes = [40, 16], strides = [1, 1]} : vector<68x16xbf16> to vector<40x16xbf16>
    %c0_12 = arith.constant 0 : index
    %c2 = arith.constant 2 : index
    %c0_13 = arith.constant 0 : index
    %c0_14 = arith.constant 0 : index
    %14 = vector.load %arg3[%c0_12, %c2, %c0_13, %c0_14] : memref<1x9x16x16xbf16, #tpu.memory_space<vmem>>, vector<1x1x16x16xbf16>
    %15 = vector.shape_cast %14 : vector<1x1x16x16xbf16> to vector<16x16xbf16>
    %cst_15 = arith.constant dense<0.000000e+00> : vector<40x16xf32>
    %16 = tpu.matmul %13, %15, %cst_15 {dimension_numbers = #tpu.dot_dimension_numbers<[1], [0], [0], [1], [0, 0, 1, 1], [], []>} : vector<40x16xbf16>, vector<16x16xbf16>, vector<40x16xf32> -> vector<40x16xf32>
    %17 = arith.addf %12, %16 : vector<40x16xf32>
    %18 = vector.extract_strided_slice %1 {offsets = [10, 0], sizes = [40, 16], strides = [1, 1]} : vector<68x16xbf16> to vector<40x16xbf16>
    %c0_16 = arith.constant 0 : index
    %c3 = arith.constant 3 : index
    %c0_17 = arith.constant 0 : index
    %c0_18 = arith.constant 0 : index
    %19 = vector.load %arg3[%c0_16, %c3, %c0_17, %c0_18] : memref<1x9x16x16xbf16, #tpu.memory_space<vmem>>, vector<1x1x16x16xbf16>
    %20 = vector.shape_cast %19 : vector<1x1x16x16xbf16> to vector<16x16xbf16>
    %cst_19 = arith.constant dense<0.000000e+00> : vector<40x16xf32>
    %21 = tpu.matmul %18, %20, %cst_19 {dimension_numbers = #tpu.dot_dimension_numbers<[1], [0], [0], [1], [0, 0, 1, 1], [], []>} : vector<40x16xbf16>, vector<16x16xbf16>, vector<40x16xf32> -> vector<40x16xf32>
    %22 = arith.addf %17, %21 : vector<40x16xf32>
    %23 = vector.extract_strided_slice %1 {offsets = [11, 0], sizes = [40, 16], strides = [1, 1]} : vector<68x16xbf16> to vector<40x16xbf16>
    %c0_20 = arith.constant 0 : index
    %c4 = arith.constant 4 : index
    %c0_21 = arith.constant 0 : index
    %c0_22 = arith.constant 0 : index
    %24 = vector.load %arg3[%c0_20, %c4, %c0_21, %c0_22] : memref<1x9x16x16xbf16, #tpu.memory_space<vmem>>, vector<1x1x16x16xbf16>
    %25 = vector.shape_cast %24 : vector<1x1x16x16xbf16> to vector<16x16xbf16>
    %cst_23 = arith.constant dense<0.000000e+00> : vector<40x16xf32>
    %26 = tpu.matmul %23, %25, %cst_23 {dimension_numbers = #tpu.dot_dimension_numbers<[1], [0], [0], [1], [0, 0, 1, 1], [], []>} : vector<40x16xbf16>, vector<16x16xbf16>, vector<40x16xf32> -> vector<40x16xf32>
    %27 = arith.addf %22, %26 : vector<40x16xf32>
    %28 = vector.extract_strided_slice %1 {offsets = [12, 0], sizes = [40, 16], strides = [1, 1]} : vector<68x16xbf16> to vector<40x16xbf16>
    %c0_24 = arith.constant 0 : index
    %c5 = arith.constant 5 : index
    %c0_25 = arith.constant 0 : index
    %c0_26 = arith.constant 0 : index
    %29 = vector.load %arg3[%c0_24, %c5, %c0_25, %c0_26] : memref<1x9x16x16xbf16, #tpu.memory_space<vmem>>, vector<1x1x16x16xbf16>
    %30 = vector.shape_cast %29 : vector<1x1x16x16xbf16> to vector<16x16xbf16>
    %cst_27 = arith.constant dense<0.000000e+00> : vector<40x16xf32>
    %31 = tpu.matmul %28, %30, %cst_27 {dimension_numbers = #tpu.dot_dimension_numbers<[1], [0], [0], [1], [0, 0, 1, 1], [], []>} : vector<40x16xbf16>, vector<16x16xbf16>, vector<40x16xf32> -> vector<40x16xf32>
    %32 = arith.addf %27, %31 : vector<40x16xf32>
    %33 = vector.extract_strided_slice %1 {offsets = [20, 0], sizes = [40, 16], strides = [1, 1]} : vector<68x16xbf16> to vector<40x16xbf16>
    %c0_28 = arith.constant 0 : index
    %c6 = arith.constant 6 : index
    %c0_29 = arith.constant 0 : index
    %c0_30 = arith.constant 0 : index
    %34 = vector.load %arg3[%c0_28, %c6, %c0_29, %c0_30] : memref<1x9x16x16xbf16, #tpu.memory_space<vmem>>, vector<1x1x16x16xbf16>
    %35 = vector.shape_cast %34 : vector<1x1x16x16xbf16> to vector<16x16xbf16>
    %cst_31 = arith.constant dense<0.000000e+00> : vector<40x16xf32>
    %36 = tpu.matmul %33, %35, %cst_31 {dimension_numbers = #tpu.dot_dimension_numbers<[1], [0], [0], [1], [0, 0, 1, 1], [], []>} : vector<40x16xbf16>, vector<16x16xbf16>, vector<40x16xf32> -> vector<40x16xf32>
    %37 = arith.addf %32, %36 : vector<40x16xf32>
    %38 = vector.extract_strided_slice %1 {offsets = [21, 0], sizes = [40, 16], strides = [1, 1]} : vector<68x16xbf16> to vector<40x16xbf16>
    %c0_32 = arith.constant 0 : index
    %c7 = arith.constant 7 : index
    %c0_33 = arith.constant 0 : index
    %c0_34 = arith.constant 0 : index
    %39 = vector.load %arg3[%c0_32, %c7, %c0_33, %c0_34] : memref<1x9x16x16xbf16, #tpu.memory_space<vmem>>, vector<1x1x16x16xbf16>
    %40 = vector.shape_cast %39 : vector<1x1x16x16xbf16> to vector<16x16xbf16>
    %cst_35 = arith.constant dense<0.000000e+00> : vector<40x16xf32>
    %41 = tpu.matmul %38, %40, %cst_35 {dimension_numbers = #tpu.dot_dimension_numbers<[1], [0], [0], [1], [0, 0, 1, 1], [], []>} : vector<40x16xbf16>, vector<16x16xbf16>, vector<40x16xf32> -> vector<40x16xf32>
    %42 = arith.addf %37, %41 : vector<40x16xf32>
    %43 = vector.extract_strided_slice %1 {offsets = [22, 0], sizes = [40, 16], strides = [1, 1]} : vector<68x16xbf16> to vector<40x16xbf16>
    %c0_36 = arith.constant 0 : index
    %c8 = arith.constant 8 : index
    %c0_37 = arith.constant 0 : index
    %c0_38 = arith.constant 0 : index
    %44 = vector.load %arg3[%c0_36, %c8, %c0_37, %c0_38] : memref<1x9x16x16xbf16, #tpu.memory_space<vmem>>, vector<1x1x16x16xbf16>
    %45 = vector.shape_cast %44 : vector<1x1x16x16xbf16> to vector<16x16xbf16>
    %cst_39 = arith.constant dense<0.000000e+00> : vector<40x16xf32>
    %46 = tpu.matmul %43, %45, %cst_39 {dimension_numbers = #tpu.dot_dimension_numbers<[1], [0], [0], [1], [0, 0, 1, 1], [], []>} : vector<40x16xbf16>, vector<16x16xbf16>, vector<40x16xf32> -> vector<40x16xf32>
    %47 = arith.addf %42, %46 : vector<40x16xf32>
    %c0_40 = arith.constant 0 : index
    %c0_41 = arith.constant 0 : index
    %48 = vector.load %arg4[%c0_40, %c0_41] : memref<1x16xf32, #tpu.memory_space<vmem>>, vector<1x16xf32>
    %49 = vector.broadcast %48 : vector<1x16xf32> to vector<40x16xf32>
    %50 = arith.addf %47, %49 : vector<40x16xf32>
    %cst_42 = arith.constant 0.000000e+00 : f32
    %51 = vector.broadcast %cst_42 : f32 to vector<40x16xf32>
    %52 = arith.maximumf %50, %51 : vector<40x16xf32>
    %c0_43 = arith.constant 0 : index
    %c0_44 = arith.constant 0 : index
    %53 = vector.load %arg5[%c0_43, %c0_44] : memref<1x16xf32, #tpu.memory_space<vmem>>, vector<1x16xf32>
    %cst_45 = arith.constant 0.000000e+00 : f32
    %54 = vector.broadcast %cst_45 : f32 to vector<40x16xf32>
    %55 = arith.minimumf %50, %54 : vector<40x16xf32>
    %56 = vector.broadcast %53 : vector<1x16xf32> to vector<40x16xf32>
    %57 = arith.mulf %56, %55 : vector<40x16xf32>
    %58 = arith.addf %52, %57 : vector<40x16xf32>
    %59 = arith.truncf %58 : vector<40x16xf32> to vector<40x16xbf16>
    %c0_46 = arith.constant 0 : index
    %c0_47 = arith.constant 0 : index
    %c0_48 = arith.constant 0 : index
    %c0_49 = arith.constant 0 : index
    %60 = vector.load %arg6[%c0_46, %c0_47, %c0_48, %c0_49] : memref<1x1x40x16xbf16, #tpu.memory_space<vmem>>, vector<1x1x40x16xbf16>
    %61 = vector.shape_cast %60 : vector<1x1x40x16xbf16> to vector<40x16xbf16>
    %62 = vector.shape_cast %59 : vector<40x16xbf16> to vector<1x1x40x16xbf16>
    tpu.vector_store %arg6[%c0_46, %c0_47, %c0_48, %c0_49], %62 {strides = array<i32>} : memref<1x1x40x16xbf16, #tpu.memory_space<vmem>>, vector<1x1x40x16xbf16>,
    return
  }
  func.func @transform_0(%arg0: i32, %arg1: i32) -> (i32, i32, i32, i32) {
    %c0_i32 = arith.constant 0 : i32
    %c0_i32_0 = arith.constant 0 : i32
    %c0_i32_1 = arith.constant 0 : i32
    return %arg0, %arg1, %c0_i32, %c0_i32_0 : i32, i32, i32, i32
  }
  func.func @transform_1(%arg0: i32, %arg1: i32) -> (i32, i32, i32, i32) {
    %c0_i32 = arith.constant 0 : i32
    %c0_i32_0 = arith.constant 0 : i32
    %c0_i32_1 = arith.constant 0 : i32
    %c0_i32_2 = arith.constant 0 : i32
    return %arg0, %c0_i32, %c0_i32_0, %c0_i32_1 : i32, i32, i32, i32
  }
  func.func @transform_2(%arg0: i32, %arg1: i32) -> (i32, i32) {
    %c0_i32 = arith.constant 0 : i32
    %c0_i32_0 = arith.constant 0 : i32
    %c0_i32_1 = arith.constant 0 : i32
    return %c0_i32, %c0_i32_0 : i32, i32
  }
  func.func @transform_3(%arg0: i32, %arg1: i32) -> (i32, i32) {
    %c0_i32 = arith.constant 0 : i32
    %c0_i32_0 = arith.constant 0 : i32
    %c0_i32_1 = arith.constant 0 : i32
    return %c0_i32, %c0_i32_0 : i32, i32
  }
  func.func @transform_4(%arg0: i32, %arg1: i32) -> (i32, i32, i32, i32) {
    %c0_i32 = arith.constant 0 : i32
    %c0_i32_0 = arith.constant 0 : i32
    %c0_i32_1 = arith.constant 0 : i32
    return %arg0, %arg1, %c0_i32, %c0_i32_0 : i32, i32, i32, i32
  }
}

</mosaic_0001>

<bundles_post_ra>
// kernel: conv2_forward.2
= control target key start
LH: loop header
LB: loop body
LE: loop exit
PB: predicated region body
PF: predicated region fallthrough
CT: control target
= control target key end

     0   :  { %s2346_s18 = smov 0   ;;  %s3109_s0 = inlined_call_operand.vmem [shape: bf16[2,4,89,4], index: 0, kind: input, shape index: {}]   ;;  %s3110_s1 = inlined_call_operand.vmem [shape: bf16[9,4,16], index: 1, kind: input, shape index: {}]   ;;  %s3111_s2 = inlined_call_operand.vmem [shape: f32[1,16], index: 2, kind: input, shape index: {}]   ;;  %s3112_s3 = inlined_call_operand.vmem [shape: f32[1,16], index: 3, kind: input, shape index: {}]   ;;  %s3113_s4 = inlined_call_operand.vmem [shape: bf16[2,72,16], index: 4, kind: output, shape index: {0}]   ;;  %s3114_s5 = inlined_call_operand.vmem [shape: f32[2,1,16], index: 5, kind: output, shape index: {1}]  }
   0x1 LB: > { %s1846_s19 = sadd.s32 4294967295, %s2312_s18   ;;  %p1850_p0 = scmp.ge.s32.totalorder %s2312_s18, 1  ;;  %s2312_s18 = sphi %s2346_s18, %s16_s18  }
   0x2   : > { %p190_p1 = scmp.lt.s32.totalorder %s2312_s18, 3 }
   0x4   : > { %p191_p2 = pnand %p1850_p0, %p190_p1 }
   0x5   : > { %v1883_v0 = vld [vmem:[%s3110_s1 + $0x2] sm:$0x3] (!%p191_p2)  ;;  %vm321_vm0 = vcmask (!%p191_p2), 1041408   ;;  %p221_p3 = scmp.lt.s32.totalorder (!%p191_p2), %s1846_s19, 1  ;;  %v2314_v1 = vmov (!%p191_p2), 0.0   ;;  %vm2315_vm1 = vmmov (!%p191_p2), 0  }
   0x6   : > { %194 = sbr.rel (%p191_p2) target bundleno = 435 (0x1b3), region = 36  ;;  %2044 = vmatprep.subr.bf16.mxu0 (!%p191_p2), %v2314_v1  ;;  %2242 = vmatprep.subr.bf16.mxu1 (!%p191_p2), %v2314_v1  ;;  %v323_v2 = vsel (!%p191_p2), %vm321_vm0, %v1883_v0, 0  ;;  %v1904_v3 = vld [vmem:[%s3110_s1 + $0x4] sm:$0x3] (!%p191_p2)  ;;  %v279_v4 = vld [vmem:[%s3110_s1] sm:$0x3] (!%p191_p2) }
   0x7   : > { %2045 = vmatpush3.bf16.msra.mxu0 (!%p191_p2), %v323_v2  ;;  %2243 = vmatpush3.bf16.msra.mxu1 (!%p191_p2), %v323_v2  ;;  %vm305_vm2 = vcmask (!%p191_p2), 31744   ;;  %v567_v5 = vsel (!%p191_p2), %vm321_vm0, %v1904_v3, 0  ;;  %v436_v6 = vsel (!%p191_p2), %vm321_vm0, %v279_v4, 0  ;;  %v1911_v10 = vld [vmem:[%s3110_s1 + $0x6] sm:$0x3] (!%p191_p2)  ;;  %vm1335_vm4 = vcmask (!%p191_p2), 1046528  }
   0x8   : > { %2046 = vmatprep.mubr.msk.bf16.mxu0 (!%p191_p2), %vm2315_vm1, %v2314_v1  ;;  %2058 = vmatprep.mubr.msk.bf16.mxu1 (!%p191_p2), %vm2315_vm1, %v2314_v1  ;;  %v1922_v28 = vld [vmem:[%s3110_s1 + $0x8] sm:$0x3] (!%p191_p2)  ;;  %v2423_v30 = vsel (!%p191_p2), %vm321_vm0, %v1911_v10, 0  ;;  %vm515_vm3 = vsmask.f32 (!%p191_p2), 7424  ;;  %vm1540_vm14 = vcmask (!%p191_p2), 125952  }
   0x9   : > { %2088 = vmatprep.subr.bf16.mxu0 (!%p191_p2), %v2314_v1  ;;  %2066 = vmatprep.subr.bf16.mxu1 (!%p191_p2), %v2314_v1  ;;  %v2443_v41 = vsel (!%p191_p2), %vm321_vm0, %v1922_v28, 0 }
   0xd   : > { %s3148_s19 = smov (!%p221_p3, %s1846_s19), 1 }
   0xe   : > { %s2244_s26 = smul.u32 192, %s3148_s19 }
   0xf   : > { %s2245_s23 = smul.u32 36, %s3148_s19 }
  0x10   : > { %s2378_s29 = scalar_lea.vmem %s3109_s0, %s2244_s26 }
  0x11   : > { %v1853_v7 = vld [vmem:[%s2378_s29 + $0x30] sm:$0xf]  ;;  %v1854_v8 = vld [vmem:[%s2378_s29 + $0x34] sm:$0xf]  ;;  %v1859_v9 = vld [vmem:[%s2378_s29 + $0x48] sm:$0xf]  ;;  %s2973_s26 = scalar_lea.vmem %s3113_s4, %s2245_s23 }
  0x12   : > { %v1884_v11 = vcombine.low %v1853_v7, %v1854_v8  ;;  %v1860_v12 = vld [vmem:[%s2378_s29 + $0x4c] sm:$0xf]  ;;  %v1855_v13 = vld [vmem:[%s2378_s29 + $0x38] sm:$0xf]  ;;  %v1856_v14 = vld [vmem:[%s2378_s29 + $0x3c] sm:$0xf] }
  0x13   : > { %v1887_v15 = vcombine.low %v1859_v9, %v1860_v12  ;;  %v2391_v16 = vcombine.low %v1854_v8, %v1855_v13  ;;  %v1861_v17 = vld [vmem:[%s2378_s29 + $0x50] sm:$0xf]  ;;  %v2395_v18 = vld [vmem:[%s2378_s29 + $0x40] sm:$0xf]  ;;  %v2398_v19 = vld [vmem:[%s2378_s29 + $0x44] sm:$0xf]  ;;  %v1885_v39 = vcombine.low %v1855_v13, %v1856_v14 }
  0x14   : > { %2047 = vmatmul.mubr.msk.bf16.vlgmr.msra.gmra.mrb[0].mxu0 %vm305_vm2, %v1884_v11  ;;  %v2401_v20 = vcombine.low %v1860_v12, %v1861_v17  ;;  %v2404_v21 = vcombine.low %v1856_v14, %v2395_v18  ;;  %v235_v22 = vld [vmem:[%s2378_s29] sm:$0xf]  ;;  %v236_v23 = vld [vmem:[%s2378_s29 + $0x4] sm:$0xf]  ;;  %v237_v24 = vld [vmem:[%s2378_s29 + $0x8] sm:$0xf]  ;;  %v2411_v25 = vcombine.low %v2398_v19, %v1859_v9  ;;  %v1888_v43 = vcombine.low %v1861_v17, %v1861_v17 }
  0x15   : > { %2059 = vmatmul.mubr.msk.bf16.vlgmr.msra.gmra.mrb[0].mxu1 %vm305_vm2, %v1887_v15  ;;  %2089 = vmatpush3.bf16.msra.mxu0 %v567_v5  ;;  %v2413_v26 = vcombine.low %v235_v22, %v236_v23  ;;  %v238_v27 = vld [vmem:[%s2378_s29 + $0xc] sm:$0xf]  ;;  %v239_v29 = vld [vmem:[%s2378_s29 + $0x10] sm:$0xf]  ;;  %v2427_v32 = vcombine.low %v236_v23, %v237_v24  ;;  %v240_v33 = vld [vmem:[%s2378_s29 + $0x14] sm:$0xf]  ;;  %v1886_v4 = vcombine.low %v2395_v18, %v2398_v19 }
  0x16   : > { %2067 = vmatpush3.bf16.msra.mxu1 %v436_v6  ;;  %2050 = vmatprep.mubr.msk.bf16.mxu0 %vm2315_vm1, %v2314_v1  ;;  %v2425_v31 = vcombine.low %v237_v24, %v238_v27  ;;  %v2430_v34 = vcombine.low %v238_v27, %v239_v29  ;;  %v1198_v35 = vshll.u32 %v2391_v16, 16  ;;  %v1203_v36 = vshll.u32 %v2404_v21, 16  ;;  %v241_v42 = vld [vmem:[%s2378_s29 + $0x18] sm:$0xf]  ;;  %v242_v46 = vld [vmem:[%s2378_s29 + $0x1c] sm:$0xf] }
  0x17   : > { %2062 = vmatprep.mubr.msk.bf16.mxu1 %vm2315_vm1, %v2314_v1  ;;  %2110 = vmatprep.subr.bf16.mxu1 %v2314_v1  ;;  %v518_v37 = vshll.u32 %v2413_v26, 16  ;;  %v2438_v38 = vcombine.low %v239_v29, %v240_v33  ;;  %v1196_v40 = vshrl.u32 %v2391_v16, 16  ;;  %v516_v45 = vshrl.u32 %v2413_v26, 16  ;;  %v2450_v47 = vld [vmem:[%s2378_s29 + $0x20] sm:$0xf]  ;;  %v2463_v56 = vld [vmem:[%s2378_s29 + $0x68] sm:$0xff]  }
  0x18   : > { %2132 = vmatprep.subr.bf16.mxu0 %v2314_v1  ;;  %v522_v44 = vshll.u32 %v2425_v31, 16  ;;  %v1049_v48 = vshll.u32 %v2427_v32, 16  ;;  %v2453_v50 = vcombine.low %v240_v33, %v241_v42  ;;  %v2456_v51 = vcombine.low %v242_v46, %v2450_v47  ;;  %v245_v52 = vld [vmem:[%s2378_s29 + $0x28] sm:$0xf]  ;;  %v2467_v57 = vld [vmem:[%s2378_s29 + $0x24] sm:$0xf] }
  0x19   : > { %v520_v49 = vrot.slane %v518_v37, 1  ;;  %v1200_v53 = vrot.slane %v1198_v35, 1  ;;  %v2459_v54 = vrot.slane %v1203_v36, 1  ;;  %v529_v55 = vshll.u32 %v2438_v38, 16  ;;  %v2481_v2 = vld [vmem:[%s2378_s29 + $0x60] sm:$0xff]   ;;  %v2488_v6 = vld [vmem:[%s2378_s29 + $0x70] sm:$0xff]  }
  0x1a   : > { %v1047_v58 = vshrl.u32 %v2427_v32, 16  ;;  %v526_v59 = vshrl.u32 %v2425_v31, 16  ;;  %v2475_v60 = vcombine.low %v2467_v57, %v245_v52  ;;  %v524_v61 = vrot.slane %v522_v44, 1  ;;  %v2491_v7 = vld [vmem:[%s2378_s29 + $0x80] sm:$0xf]  ;;  %v2502_v13 = vld [vmem:[%s2378_s29 + $0x78] sm:$0xff]  }
  0x1b   : > { %v1051_v62 = vrot.slane %v1049_v48, 1  ;;  %v521_v63 = vor.u32 %v520_v49, %v516_v45  ;;  %v909_v0 = vshll.u32 %v2463_v56, 16  ;;  %v1201_v3 = vor.u32 %v1200_v53, %v1196_v40  ;;  %v1873_v11 = vld [vmem:[%s2378_s29 + $0x84] sm:$0xf] }
  0x1c   : > { %2051 = vmatmul.mubr.msk.bf16.gmra.mrb[4].mxu0 %vm305_vm2, %v1885_v39  ;;  %v2485_v5 = vrot.slane %v529_v55, 1  ;;  %v2498_v10 = vcombine.low %v241_v42, %v242_v46  ;;  %v2505_v14 = vcombine.low %v2491_v7, %v1873_v11  ;;  %v903_v15 = vshrl.u32 %v2481_v2, 16 }
  0x1d   : > { %2063 = vmatmul.mubr.msk.bf16.gmra.mrb[4].mxu1 %vm305_vm2, %v1888_v43  ;;  %2054 = vmatprep.mubr.msk.bf16.mxu0 %vm2315_vm1, %v2314_v1  ;;  %v2495_v8 = vsel %vm515_vm3, %v1201_v3, %v2459_v54  ;;  %v525_v9 = vsel %vm515_vm3, %v521_v63, %v524_v61  ;;  %v911_v12 = vrot.slane %v909_v0, 1  ;;  %v1052_v16 = vor.u32 %v1051_v62, %v1047_v58 }
  0x1e   : > { %2068 = vmatprep.mubr.msk.bf16.mxu1 %vm2315_vm1, %v2314_v1  ;;  %v905_v17 = vshll.u32 %v2481_v2, 16  ;;  %v913_v18 = vshrl.u32 %v2463_v56, 16  ;;  %v916_v19 = vshll.u32 %v2488_v6, 16  ;;  %v1054_v22 = vshll.u32 %v2430_v34, 16 }
  0x1f   : > { %v920_v23 = vshrl.u32 %v2488_v6, 16  ;;  %v923_v24 = vshll.u32 %v2502_v13, 16  ;;  %v1058_v27 = vshrl.u32 %v2430_v34, 16  ;;  %v1062_v28 = vshll.u32 %v2453_v50, 16 }
  0x20   : > { %v907_v29 = vrot.slane %v905_v17, 1  ;;  %v915_v33 = vor.u32 %v913_v18, %v911_v12  ;;  %v918_v35 = vrot.slane %v916_v19, 1  ;;  %v927_v39 = vshrl.u32 %v2502_v13, 16 }
  0x21   : > { %v925_v36 = vrot.slane %v923_v24, 1  ;;  %v1064_v37 = vrot.slane %v1062_v28, 1  ;;  %v931_v40 = vshll.u32 %v2505_v14, 16  ;;  %v1066_v49 = vshrl.u32 %v2453_v50, 16 }
  0x22   : > { %v908_v42 = vor.u32 %v907_v29, %v903_v15  ;;  %v2528_v43 = vsel %vm515_vm3, %v915_v33, %v918_v35  ;;  %v922_v44 = vor.u32 %v920_v23, %v918_v35  ;;  %v533_v52 = vshrl.u32 %v2438_v38, 16 }
  0x23   : > { %v929_v46 = vor.u32 %v927_v39, %v925_v36  ;;  %v2533_v48 = vrot.slane %v931_v40, 1  ;;  %v1070_v58 = vshll.u32 %v2456_v51, 16  ;;  %v1068_v0 = vor.u32 %v1066_v49, %v1064_v37 }
  0x24   : > { %2055 = vmatmul.mubr.msk.bf16.gmra.mrb[8].mxu0 %vm305_vm2, %v1886_v4  ;;  %v2538_v53 = vsel %vm515_vm3, %v908_v42, %v911_v12  ;;  %v2541_v55 = vsel %vm515_vm3, %v922_v44, %v925_v36  ;;  %v1074_v3 = vshrl.u32 %v2456_v51, 16  ;;  %v528_v4 = vor.u32 %v526_v59, %v524_v61 }
  0x25   : > { %2069 = vmatmul.mubr.msk.bf16.vlgmr.msra.gmra.mrb[8].mxu1 %vm305_vm2, %v2413_v26  ;;  %2090 = vmatprep.mubr.msk.bf16.mxu0 %vm2315_vm1, %v2314_v1  ;;  %v1056_v26 = vrot.slane %v1054_v22, 1  ;;  %v2549_v63 = vsel %vm515_vm3, %v929_v46, %v2533_v48  ;;  %v536_v11 = vshll.u32 %v2498_v10, 16  ;;  %v1072_v12 = vrot.slane %v1070_v58, 1 }
  0x26   : > { %2111 = vmatpush3.bf16.msra.mxu1 %v2423_v30  ;;  %2072 = vmatprep.mubr.msk.bf16.mxu1 %vm2315_vm1, %v2314_v1  ;;  %v1078_v15 = vshll.u32 %v2475_v60, 16  ;;  %v1211_v17 = vshll.u32 %v2411_v25, 16  ;;  %v1336_v18 = vrot.slane %v2427_v32, 1  ;;  %v1215_v19 = vshrl.u32 %v2411_v25, 16 }
  0x27   : > { %2154 = vmatprep.subr.bf16.mxu1 %v2314_v1  ;;  %v2531_v30 = vsel %vm515_vm3, %v1052_v16, %v1056_v26  ;;  %v1060_v45 = vor.u32 %v1058_v27, %v1056_v26  ;;  %v1207_v16 = vshrl.u32 %v2404_v21, 16  ;;  %v2566_v59 = vsel %vm515_vm3, %v1068_v0, %v1072_v12  ;;  %v2572_v21 = vld [vmem:[%s2378_s29 + $0x54] sm:$0xff]  }
  0x28   : > { %v1076_v61 = vor.u32 %v1074_v3, %v1072_v12  ;;  %v1219_v22 = vshll.u32 %v2401_v20, 16  ;;  %v532_v23 = vsel %vm515_vm3, %v528_v4, %v2485_v5  ;;  %v1339_v27 = vrot.slane %v2453_v50, 1  ;;  %v1933_v3 = vld [vmem:[%s3110_s1 + $0xa] sm:$0x3]  ;;  %v1940_v4 = vld [vmem:[%s3110_s1 + $0xc] sm:$0x3] }
  0x29   : > { %v2545_v62 = vsel %vm515_vm3, %v1060_v45, %v1064_v37  ;;  %v1209_v32 = vor.u32 %v1207_v16, %v2459_v54  ;;  %v1223_v25 = vshrl.u32 %v2401_v20, 16  ;;  %v1227_v35 = vshll.u32 %v2572_v21, 16  ;;  %v1951_v16 = vld [vmem:[%s3110_s1 + $0xe] sm:$0x3] }
  0x2a   : > { %v1221_v29 = vrot.slane %v1219_v22, 1  ;;  %v1341_v26 = vrot.slane %v2456_v51, 1  ;;  %v535_v20 = vor.u32 %v533_v52, %v2485_v5  ;;  %v538_v51 = vrot.slane %v536_v11, 1  ;;  %v2296_v11 = vld [vmem:[%s2378_s29 + $0x90] sm:$0xff]  }
  0x2b   : > { %v2601_v50 = vrot.slane %v1227_v35, 1  ;;  %v1905_v40 = vcombine.low %v2450_v47, %v2467_v57  ;;  %v1343_v46 = vrot.slane %v2475_v60, 1  ;;  %v1898_v52 = vcombine.low %v2450_v47, %v2450_v47 }
  0x2c   : > { %2091 = vmatmul.mubr.msk.bf16.vlgmr.msra.gmra.mrb[12].mxu0 %vm305_vm2, %v525_v9  ;;  %v1213_v9 = vrot.slane %v1211_v17, 1  ;;  %v1225_v37 = vor.u32 %v1223_v25, %v1221_v29  ;;  %v2604_v39 = vsel %vm1335_vm4, %v1339_v27, %v1341_v26  ;;  %v539_v44 = vsel %vm515_vm3, %v535_v20, %v538_v51 }
  0x2d   : > { %2073 = vmatmul.mubr.msk.bf16.gmra.mrb[12].mxu1 %vm305_vm2, %v2425_v31  ;;  %2133 = vmatpush3.bf16.msra.mxu0 %v2443_v41  ;;  %v2568_v31 = vrot.slane %v1078_v15, 1  ;;  %v1337_v41 = vrot.slane %v2430_v34, 1  ;;  %v544_v45 = vshll.u32 %v1905_v40, 16  ;;  %v2626_v57 = vsel %vm1335_vm4, %v1341_v26, %v1343_v46  ;;  %v2303_v15 = vld [vmem:[%s2378_s29 + $0xa8] sm:$0xff]  }
  0x2e   : > { %2076 = vmatprep.mubr.msk.bf16.mxu1 %vm2315_vm1, %v2314_v1  ;;  %2094 = vmatprep.mubr.msk.bf16.mxu0 %vm2315_vm1, %v2314_v1  ;;  %v2589_v28 = vsel %vm515_vm3, %v1209_v32, %v1213_v9  ;;  %v1217_v54 = vor.u32 %v1215_v19, %v1213_v9  ;;  %v2617_v42 = vsel %vm515_vm3, %v1225_v37, %v2601_v50  ;;  %v548_v0 = vshrl.u32 %v1905_v40, 16 }
  0x2f   : > { %2176 = vmatprep.subr.bf16.mxu0 %v2314_v1  ;;  %v2582_v24 = vsel %vm515_vm3, %v1076_v61, %v2568_v31  ;;  %v2585_v34 = vsel %vm1335_vm4, %v1336_v18, %v1337_v41  ;;  %v2593_v33 = vsel %vm1335_vm4, %v1337_v41, %v1339_v27  ;;  %v546_v49 = vrot.slane %v544_v45, 1 }
  0x30   : > { %v2598_v36 = vsel %vm515_vm3, %v1217_v54, %v1221_v29  ;;  %v954_v47 = vsel %vm321_vm0, %v1933_v3, 0  ;;  %v1101_v12 = vsel %vm321_vm0, %v1940_v4, 0  ;;  %v1250_v17 = vsel %vm321_vm0, %v1951_v16, 0 }
  0x34   : > { %2095 = vmatmul.mubr.msk.bf16.gmra.mrb[16].mxu0 %vm305_vm2, %v532_v23 }
  0x35   : > { %2077 = vmatmul.mubr.msk.bf16.gmra.mrb[16].mxu1 %vm305_vm2, %v2438_v38  ;;  %2098 = vmatprep.mubr.msk.bf16.mxu0 %vm2315_vm1, %v2314_v1  ;;  %v540_v38 = vshrl.u32 %v2498_v10, 16 }
  0x36   : > { %2080 = vmatprep.mubr.msk.bf16.mxu1 %vm2315_vm1, %v2314_v1 }
  0x37   : > { %v542_v5 = vor.u32 %v540_v38, %v538_v51 }
  0x39   : > { %v547_v58 = vsel %vm515_vm3, %v542_v5, %v546_v49 }
  0x3c   : > { %2099 = vmatmul.mubr.msk.bf16.gmra.mrb[20].mxu0 %vm305_vm2, %v539_v44 }
  0x3d   : > { %2081 = vmatmul.mubr.msk.bf16.gmra.mrb[20].mxu1 %vm305_vm2, %v2498_v10  ;;  %2102 = vmatprep.mubr.msk.bf16.mxu0 %vm2315_vm1, %v2314_v1  ;;  %v550_v10 = vor.u32 %v548_v0, %v546_v49 }
  0x3e   : > { %2084 = vmatprep.mubr.msk.bf16.mxu1 %vm2315_vm1, %v2314_v1 }
  0x44   : > { %2103 = vmatmul.mubr.msk.bf16.gmra.mrb[24].mxu0 %vm305_vm2, %v547_v58 }
  0x45   : > { %2085 = vmatmul.mubr.msk.bf16.gmra.mrb[24].mxu1 %vm305_vm2, %v1898_v52  ;;  %2106 = vmatprep.mubr.msk.bf16.mxu0 %vm2315_vm1, %v2314_v1 }
  0x46   : > { %2112 = vmatprep.mubr.msk.bf16.mxu1 %vm2315_vm1, %v2314_v1 }
  0x4c   : > { %2107 = vmatmul.mubr.msk.bf16.gmra.mrb[28].mxu0 %vm305_vm2, %v550_v10 }
  0x4d   : > { %2113 = vmatmul.mubr.msk.bf16.vlgmr.msra.gmra.mrb[28].mxu1 %vm305_vm2, %v2481_v2  ;;  %2134 = vmatprep.mubr.msk.bf16.mxu0 %vm2315_vm1, %v2314_v1  ;;  %v2298_v2 = vld [vmem:[%s2378_s29 + $0x98] sm:$0xff]  }
  0x4e   : > { %2155 = vmatpush3.bf16.msra.mxu1 %v954_v47  ;;  %2116 = vmatprep.mubr.msk.bf16.mxu1 %vm2315_vm1, %v2314_v1 }
  0x4f   : > { %2198 = vmatprep.subr.bf16.mxu1 %v2314_v1 }
  0x54   : > { %2135 = vmatmul.mubr.msk.bf16.vlgmr.msra.gmra.mrb[32].mxu0 %vm305_vm2, %v2296_v11 }
  0x55   : > { %2117 = vmatmul.mubr.msk.bf16.gmra.mrb[32].mxu1 %vm305_vm2, %v2463_v56  ;;  %2177 = vmatpush3.bf16.msra.mxu0 %v1101_v12  ;;  %v2300_v56 = vld [vmem:[%s2378_s29 + $0xa0] sm:$0xff]  }
  0x56   : > { %2120 = vmatprep.mubr.msk.bf16.mxu1 %vm2315_vm1, %v2314_v1  ;;  %2138 = vmatprep.mubr.msk.bf16.mxu0 %vm2315_vm1, %v2314_v1 }
  0x57   : > { %2220 = vmatprep.subr.bf16.mxu0 %v2314_v1 }
  0x5c   : > { %2139 = vmatmul.mubr.msk.bf16.gmra.mrb[36].mxu0 %vm305_vm2, %v2298_v2 }
  0x5d   : > { %2121 = vmatmul.mubr.msk.bf16.gmra.mrb[36].mxu1 %vm305_vm2, %v2488_v6  ;;  %2142 = vmatprep.mubr.msk.bf16.mxu0 %vm2315_vm1, %v2314_v1  ;;  %v1916_v6 = vcombine.low %v2491_v7, %v2491_v7  ;;  %v1962_v7 = vld [vmem:[%s3110_s1 + $0x10] sm:$0x3] }
  0x5e   : > { %2124 = vmatprep.mubr.msk.bf16.mxu1 %vm2315_vm1, %v2314_v1  ;;  %v1361_v18 = vsel %vm321_vm0, %v1962_v7, 0 }
  0x64   : > { %2143 = vmatmul.mubr.msk.bf16.gmra.mrb[40].mxu0 %vm305_vm2, %v2300_v56 }
  0x65   : > { %2125 = vmatmul.mubr.msk.bf16.gmra.mrb[40].mxu1 %vm305_vm2, %v2502_v13  ;;  %2146 = vmatprep.mubr.msk.bf16.mxu0 %vm2315_vm1, %v2314_v1  ;;  %v2304_v13 = vld [vmem:[%s2378_s29 + $0xb0] ss:$0 sps:$4 sm:$0xff]   ;;  %s233_s29 = scalar_lea.vmem %s3114_s5, %s3148_s19 }
  0x66   : > { %2128 = vmatprep.mubr.msk.bf16.mxu1 %vm2315_vm1, %v2314_v1 }
  0x6c   : > { %2147 = vmatmul.mubr.msk.bf16.gmra.mrb[44].mxu0 %vm305_vm2, %v2303_v15 }
  0x6d   : > { %2129 = vmatmul.mubr.msk.bf16.gmra.mrb[44].mxu1 %vm305_vm2, %v1916_v6  ;;  %2150 = vmatprep.mubr.msk.bf16.mxu0 %vm2315_vm1, %v2314_v1 }
  0x6e   : > { %2156 = vmatprep.mubr.msk.bf16.mxu1 %vm2315_vm1, %v2314_v1 }
  0x74   : > { %2151 = vmatmul.mubr.msk.bf16.gmra.mrb[48].mxu0 %vm305_vm2, %v2304_v13 }
  0x75   : > { %2157 = vmatmul.mubr.msk.bf16.vlgmr.msra.gmra.mrb[48].mxu1 %vm305_vm2, %v2538_v53  ;;  %2178 = vmatprep.mubr.msk.bf16.mxu0 %vm2315_vm1, %v2314_v1  ;;  %v1082_v53 = vshrl.u32 %v2475_v60, 16 }
  0x76   : > { %2199 = vmatpush3.bf16.msra.mxu1 %v1250_v17  ;;  %2160 = vmatprep.mubr.msk.bf16.mxu1 %vm2315_vm1, %v2314_v1 }
  0x7c   : > { %2179 = vmatmul.mubr.msk.bf16.vlgmr.msra.gmra.mrb[52].mxu0 %vm305_vm2, %v2531_v30 }
  0x7d   : > { %2161 = vmatmul.mubr.msk.bf16.gmra.mrb[52].mxu1 %vm305_vm2, %v2528_v43  ;;  %2221 = vmatpush3.bf16.msra.mxu0 %v1361_v18  ;;  %v935_v43 = vshrl.u32 %v2505_v14, 16  ;;  %v1084_v14 = vor.u32 %v1082_v53, %v2568_v31 }
  0x7e   : > { %2164 = vmatprep.mubr.msk.bf16.mxu1 %vm2315_vm1, %v2314_v1  ;;  %2182 = vmatprep.mubr.msk.bf16.mxu0 %vm2315_vm1, %v2314_v1 }
  0x7f   : > { %v937_v30 = vor.u32 %v935_v43, %v2533_v48 }
  0x84   : > { %2183 = vmatmul.mubr.msk.bf16.gmra.mrb[56].mxu0 %vm305_vm2, %v2545_v62 }
  0x85   : > { %2165 = vmatmul.mubr.msk.bf16.gmra.mrb[56].mxu1 %vm305_vm2, %v2541_v55  ;;  %2186 = vmatprep.mubr.msk.bf16.mxu0 %vm2315_vm1, %v2314_v1 }
  0x86   : > { %2168 = vmatprep.mubr.msk.bf16.mxu1 %vm2315_vm1, %v2314_v1 }
  0x8c   : > { %2187 = vmatmul.mubr.msk.bf16.gmra.mrb[60].mxu0 %vm305_vm2, %v2566_v59 }
  0x8d   : > { %2169 = vmatmul.mubr.msk.bf16.gmra.mrb[60].mxu1 %vm305_vm2, %v2549_v63  ;;  %2190 = vmatprep.mubr.msk.bf16.mxu0 %vm2315_vm1, %v2314_v1 }
  0x8e   : > { %2172 = vmatprep.mubr.msk.bf16.mxu1 %vm2315_vm1, %v2314_v1 }
  0x94   : > { %2191 = vmatmul.mubr.msk.bf16.gmra.mrb[64].mxu0 %vm305_vm2, %v2582_v24 }
  0x95   : > { %2173 = vmatmul.mubr.msk.bf16.gmra.mrb[64].mxu1 %vm305_vm2, %v937_v30  ;;  %2194 = vmatprep.mubr.msk.bf16.mxu0 %vm2315_vm1, %v2314_v1 }
  0x96   : > { %2200 = vmatprep.mubr.msk.bf16.mxu1 %vm2315_vm1, %v2314_v1 }
  0x9c   : > { %2195 = vmatmul.mubr.msk.bf16.gmra.mrb[68].mxu0 %vm305_vm2, %v1084_v14 }
  0x9d   : > { %2201 = vmatmul.mubr.msk.bf16.vlgmr.msra.gmra.mrb[68].mxu1 %vm305_vm2, %v2495_v8  ;;  %2222 = vmatprep.mubr.msk.bf16.mxu0 %vm2315_vm1, %v2314_v1  ;;  %v1231_v8 = vshrl.u32 %v2572_v21, 16 }
  0x9e   : > { %2204 = vmatprep.mubr.msk.bf16.mxu1 %vm2315_vm1, %v2314_v1 }
  0x9f   : > { %v1233_v48 = vor.u32 %v1231_v8, %v2601_v50 }
  0xa4   : > { %2223 = vmatmul.mubr.msk.bf16.vlgmr.msra.gmra.mrb[72].mxu0 %vm305_vm2, %v2585_v34 }
  0xa5   : > { %2205 = vmatmul.mubr.msk.bf16.gmra.mrb[72].mxu1 %vm305_vm2, %v2589_v28  ;;  %2226 = vmatprep.mubr.msk.bf16.mxu0 %vm2315_vm1, %v2314_v1 }
  0xa6   : > { %2208 = vmatprep.mubr.msk.bf16.mxu1 %vm2315_vm1, %v2314_v1 }
  0xac   : > { %2227 = vmatmul.mubr.msk.bf16.gmra.mrb[76].mxu0 %vm305_vm2, %v2593_v33 }
  0xad   : > { %2209 = vmatmul.mubr.msk.bf16.gmra.mrb[76].mxu1 %vm305_vm2, %v2598_v36  ;;  %2230 = vmatprep.mubr.msk.bf16.mxu0 %vm2315_vm1, %v2314_v1 }
  0xae   : > { %2212 = vmatprep.mubr.msk.bf16.mxu1 %vm2315_vm1, %v2314_v1 }
  0xb4   : > { %2231 = vmatmul.mubr.msk.bf16.gmra.mrb[80].mxu0 %vm305_vm2, %v2604_v39 }
  0xb5   : > { %2213 = vmatmul.mubr.msk.bf16.gmra.mrb[80].mxu1 %vm305_vm2, %v2617_v42  ;;  %2234 = vmatprep.mubr.msk.bf16.mxu0 %vm2315_vm1, %v2314_v1 }
  0xb6   : > { %2216 = vmatprep.mubr.msk.bf16.mxu1 %vm2315_vm1, %v2314_v1 }
  0xbc   : > { %2235 = vmatmul.mubr.msk.bf16.gmra.mrb[84].mxu0 %vm305_vm2, %v2626_v57 }
  0xbd   : > { %2217 = vmatmul.mubr.msk.bf16.gmra.mrb[84].mxu1 %vm305_vm2, %v1233_v48  ;;  %2238 = vmatprep.mubr.msk.bf16.mxu0 %vm2315_vm1, %v2314_v1  ;;  %vm1740_vm1 = vcmask 130048  }
  0xc4   : > { %2239 = vmatmul.mubr.msk.bf16.gmra.mrb[88].mxu0 %vm305_vm2, %v1343_v46 }
  0xe7   : > { %v359_v55 = vpop.f32.mrb[0].mxu0 }
  0xe8   : > { %v2048_v62 = vpop.f32.mrb[1].mxu0  ;;  %v383_v63 = vpop.f32.mrb[0].mxu1 }
  0xe9   : > { %v362_v59 = vpop.f32.mrb[2].mxu0  ;;  %v2060_v61 = vpop.f32.mrb[1].mxu1 }
  0xea   : > { %v2049_v31 = vpop.f32.mrb[3].mxu0  ;;  %v386_v41 = vpop.f32.mrb[2].mxu1 }
  0xeb   : > { %v2061_v21 = vpop.f32.mrb[3].mxu1 }
  0xef   : > { %v367_v32 = vpop.f32.mrb[4].mxu0 }
  0xf0   : > { %v2052_v9 = vpop.f32.mrb[5].mxu0  ;;  %v391_v19 = vpop.f32.mrb[4].mxu1 }
  0xf1   : > { %v370_v22 = vpop.f32.mrb[6].mxu0  ;;  %v2064_v23 = vpop.f32.mrb[5].mxu1 }
  0xf2   : > { %v2053_v24 = vpop.f32.mrb[7].mxu0  ;;  %v394_v34 = vpop.f32.mrb[6].mxu1 }
  0xf3   : > { %v2065_v1 = vpop.f32.mrb[7].mxu1 }
  0xf7   : > { %v375_v27 = vpop.f32.mrb[8].mxu0 }
  0xf8   : > { %v472_v60 = vpop.f32.mrb[8].mxu1  ;;  %v2056_v28 = vpop.f32.mrb[9].mxu0 }
  0xf9   : > { %v473_v54 = vadd.f32 %v472_v60, %v359_v55  ;;  %v2070_v29 = vpop.f32.mrb[9].mxu1  ;;  %v378_v25 = vpop.f32.mrb[10].mxu0 }
  0xfa   : > { %v475_v33 = vpop.f32.mrb[10].mxu1  ;;  %v2057_v35 = vpop.f32.mrb[11].mxu0 }
  0xfb   : > { %v476_v26 = vadd.f32 %v475_v33, %v362_v59  ;;  %v2071_v36 = vpop.f32.mrb[11].mxu1 }
  0xff   : > { %v603_v37 = vpop.f32.mrb[12].mxu0 }
 0x100   : > { %v480_v50 = vpop.f32.mrb[12].mxu1  ;;  %v641_v39 = vadd.f32 %v603_v37, %v473_v54  ;;  %v2092_v20 = vpop.f32.mrb[13].mxu0 }
 0x101   : > { %v481_v51 = vadd.f32 %v480_v50, %v367_v32  ;;  %v2074_v40 = vpop.f32.mrb[13].mxu1  ;;  %v606_v42 = vpop.f32.mrb[14].mxu0 }
 0x102   : > { %v483_v44 = vpop.f32.mrb[14].mxu1  ;;  %v642_v38 = vadd.f32 %v606_v42, %v476_v26  ;;  %v2093_v45 = vpop.f32.mrb[15].mxu0 }
 0x103   : > { %v484_v46 = vadd.f32 %v483_v44, %v370_v22  ;;  %v2075_v57 = vpop.f32.mrb[15].mxu1 }
 0x107   : > { %v611_v5 = vpop.f32.mrb[16].mxu0 }
 0x108   : > { %v488_v49 = vpop.f32.mrb[16].mxu1  ;;  %v643_v52 = vadd.f32 %v611_v5, %v481_v51  ;;  %v2096_v58 = vpop.f32.mrb[17].mxu0 }
 0x109   : > { %v489_v0 = vadd.f32 %v488_v49, %v375_v27  ;;  %v2078_v10 = vpop.f32.mrb[17].mxu1  ;;  %v614_v3 = vpop.f32.mrb[18].mxu0 }
 0x10a   : > { %v491_v47 = vpop.f32.mrb[18].mxu1  ;;  %v644_v4 = vadd.f32 %v614_v3, %v484_v46  ;;  %v2097_v11 = vpop.f32.mrb[19].mxu0 }
 0x10b   : > { %v492_v12 = vadd.f32 %v491_v47, %v378_v25  ;;  %v2079_v2 = vpop.f32.mrb[19].mxu1 }
 0x10f   : > { %v619_v56 = vpop.f32.mrb[20].mxu0 }
 0x110   : > { %v496_v15 = vpop.f32.mrb[20].mxu1  ;;  %v645_v6 = vadd.f32 %v619_v56, %v489_v0  ;;  %v2100_v13 = vpop.f32.mrb[21].mxu0 }
 0x111   : > { %v497_v16 = vadd.f32 %v496_v15, %v383_v63  ;;  %v2082_v17 = vpop.f32.mrb[21].mxu1  ;;  %v622_v7 = vpop.f32.mrb[22].mxu0 }
 0x112   : > { %v499_v18 = vpop.f32.mrb[22].mxu1  ;;  %v646_v43 = vadd.f32 %v622_v7, %v492_v12  ;;  %v2101_v30 = vpop.f32.mrb[23].mxu0 }
 0x113   : > { %v500_v53 = vadd.f32 %v499_v18, %v386_v41  ;;  %v2083_v14 = vpop.f32.mrb[23].mxu1 }
 0x117   : > { %v627_v8 = vpop.f32.mrb[24].mxu0 }
 0x118   : > { %v504_v48 = vpop.f32.mrb[24].mxu1  ;;  %v647_v55 = vadd.f32 %v627_v8, %v497_v16  ;;  %v2104_v62 = vpop.f32.mrb[25].mxu0 }
 0x119   : > { %v505_v59 = vadd.f32 %v504_v48, %v391_v19  ;;  %v630_v61 = vpop.f32.mrb[26].mxu0  ;;  %v2086_v31 = vpop.f32.mrb[25].mxu1 }
 0x11a   : > { %v648_v21 = vadd.f32 %v630_v61, %v500_v53  ;;  %v2105_v32 = vpop.f32.mrb[27].mxu0  ;;  %v507_v9 = vpop.f32.mrb[26].mxu1 }
 0x11b   : > { %v2087_v22 = vpop.f32.mrb[27].mxu1 }
 0x11f   : > { %v635_v23 = vpop.f32.mrb[28].mxu0 }
 0x120   : > { %v649_v63 = vadd.f32 %v635_v23, %v505_v59  ;;  %v727_v24 = vpop.f32.mrb[28].mxu1  ;;  %v2108_v34 = vpop.f32.mrb[29].mxu0 }
 0x121   : > { %v765_v1 = vadd.f32 %v727_v24, %v641_v39  ;;  %v2114_v27 = vpop.f32.mrb[29].mxu1  ;;  %v638_v60 = vpop.f32.mrb[30].mxu0 }
 0x122   : > { %v730_v41 = vpop.f32.mrb[30].mxu1  ;;  %v2109_v28 = vpop.f32.mrb[31].mxu0 }
 0x123   : > { %v766_v54 = vadd.f32 %v730_v41, %v642_v38  ;;  %v2115_v29 = vpop.f32.mrb[31].mxu1 }
 0x127   : > { %v851_v25 = vpop.f32.mrb[32].mxu0 }
 0x128   : > { %v735_v33 = vpop.f32.mrb[32].mxu1  ;;  %v889_v19 = vadd.f32 %v851_v25, %v765_v1  ;;  %v2136_v35 = vpop.f32.mrb[33].mxu0 }
 0x129   : > { %v767_v26 = vadd.f32 %v735_v33, %v643_v52  ;;  %v2118_v36 = vpop.f32.mrb[33].mxu1  ;;  %v854_v37 = vpop.f32.mrb[34].mxu0 }
 0x12a   : > { %v738_v50 = vpop.f32.mrb[34].mxu1  ;;  %v890_v20 = vadd.f32 %v854_v37, %v766_v54  ;;  %v2137_v51 = vpop.f32.mrb[35].mxu0  ;;  %v1550_v54 = vlaneseq }
 0x12b   : > { %v768_v40 = vadd.f32 %v738_v50, %v644_v4  ;;  %v2119_v42 = vpop.f32.mrb[35].mxu1 }
 0x12c   : > { %v2791_v50 = vshrl.u32 %v1550_v54, 7 }
 0x12f   : > { %v859_v44 = vpop.f32.mrb[36].mxu0 }
 0x130   : > { %v743_v39 = vpop.f32.mrb[36].mxu1  ;;  %v891_v45 = vadd.f32 %v859_v44, %v767_v26  ;;  %v2140_v46 = vpop.f32.mrb[37].mxu0  ;;  %v1552_v44 = vadd.s32 8, %v2791_v50 }
 0x131   : > { %v769_v57 = vadd.f32 %v743_v39, %v645_v6  ;;  %v2122_v5 = vpop.f32.mrb[37].mxu1  ;;  %v862_v38 = vpop.f32.mrb[38].mxu0 }
 0x132   : > { %v746_v49 = vpop.f32.mrb[38].mxu1  ;;  %v892_v58 = vadd.f32 %v862_v38, %v768_v40  ;;  %v2141_v0 = vpop.f32.mrb[39].mxu0 }
 0x133   : > { %v770_v10 = vadd.f32 %v746_v49, %v646_v43  ;;  %v2123_v3 = vpop.f32.mrb[39].mxu1 }
 0x137   : > { %v867_v52 = vpop.f32.mrb[40].mxu0 }
 0x138   : > { %v751_v47 = vpop.f32.mrb[40].mxu1  ;;  %v893_v11 = vadd.f32 %v867_v52, %v769_v57  ;;  %v2144_v12 = vpop.f32.mrb[41].mxu0  ;;  %v2802_v3 = vmul.u32.u64.low 3817748708, %v1552_v44  ;;  %v2803_v52 = vmul.u32.u64.high 3817748708, %v1552_v44, %v2802_v3 }
 0x139   : > { %v771_v2 = vadd.f32 %v751_v47, %v647_v55  ;;  %v2126_v56 = vpop.f32.mrb[41].mxu1  ;;  %v870_v4 = vpop.f32.mrb[42].mxu0 }
 0x13a   : > { %v754_v15 = vpop.f32.mrb[42].mxu1  ;;  %v894_v13 = vadd.f32 %v870_v4, %v770_v10  ;;  %v2145_v16 = vpop.f32.mrb[43].mxu0  ;;  %v2808_v56 = vadd.s32 16, %v2791_v50 }
 0x13b   : > { %v772_v17 = vadd.f32 %v754_v15, %v648_v21  ;;  %v2127_v7 = vpop.f32.mrb[43].mxu1 }
 0x13f   : > { %v875_v6 = vpop.f32.mrb[44].mxu0 }
 0x140   : > { %v759_v18 = vpop.f32.mrb[44].mxu1  ;;  %v895_v30 = vadd.f32 %v875_v6, %v771_v2  ;;  %v2148_v53 = vpop.f32.mrb[45].mxu0 }
 0x141   : > { %v773_v14 = vadd.f32 %v759_v18, %v649_v63  ;;  %v878_v8 = vpop.f32.mrb[46].mxu0  ;;  %v2130_v43 = vpop.f32.mrb[45].mxu1 }
 0x142   : > { %v896_v48 = vadd.f32 %v878_v8, %v772_v17  ;;  %v2149_v62 = vpop.f32.mrb[47].mxu0  ;;  %v762_v59 = vpop.f32.mrb[46].mxu1  ;;  %v1554_v17 = vadd.s32 24, %v2791_v50  ;;  %v1577_v8 = vshrl.u32 %v2803_v52, 3 }
 0x143   : > { %v2131_v61 = vpop.f32.mrb[47].mxu1  ;;  %v2816_v43 = vmul.u32.u64.low 3817748708, %v2808_v56  ;;  %v2817_v62 = vmul.u32.u64.high 3817748708, %v2808_v56, %v2816_v43 }
 0x144   : > { %v2823_v61 = vadd.s32 32, %v2791_v50  ;;  %v2890_v43 = vadd.s32 56, %v2791_v50 }
 0x147   : > { %v883_v31 = vpop.f32.mrb[48].mxu0 }
 0x148   : > { %v2785_v55 = vadd.f32 %v883_v31, %v773_v14  ;;  %v990_v32 = vpop.f32.mrb[48].mxu1  ;;  %v2152_v9 = vpop.f32.mrb[49].mxu0 }
 0x149   : > { %v1028_v22 = vadd.f32 %v990_v32, %v889_v19  ;;  %v2158_v23 = vpop.f32.mrb[49].mxu1  ;;  %v886_v21 = vpop.f32.mrb[50].mxu0  ;;  %v2826_v9 = vadd.s32 40, %v2791_v50 }
 0x14a   : > { %v993_v24 = vpop.f32.mrb[50].mxu1  ;;  %v2153_v34 = vpop.f32.mrb[51].mxu0  ;;  %v1578_v21 = vmul.u32 9, %v1577_v8 }
 0x14b   : > { %v1029_v1 = vadd.f32 %v993_v24, %v890_v20  ;;  %v2159_v27 = vpop.f32.mrb[51].mxu1 }
 0x14f   : > { %v1137_v60 = vpop.f32.mrb[52].mxu0 }
 0x150   : > { %v998_v63 = vpop.f32.mrb[52].mxu1  ;;  %v2787_v41 = vadd.f32 %v1137_v60, %v1028_v22  ;;  %v2180_v28 = vpop.f32.mrb[53].mxu0  ;;  %v2832_v27 = vmul.u32.u64.low 3817748708, %v2823_v61  ;;  %v2833_v60 = vmul.u32.u64.high 3817748708, %v2823_v61, %v2832_v27 }
 0x151   : > { %v1030_v29 = vadd.f32 %v998_v63, %v891_v45  ;;  %v2162_v25 = vpop.f32.mrb[53].mxu1  ;;  %v1140_v33 = vpop.f32.mrb[54].mxu0 }
 0x152   : > { %v1001_v35 = vpop.f32.mrb[54].mxu1  ;;  %v2789_v26 = vadd.f32 %v1140_v33, %v1029_v1  ;;  %v2181_v36 = vpop.f32.mrb[55].mxu0 }
 0x153   : > { %v1031_v19 = vadd.f32 %v1001_v35, %v892_v58  ;;  %v2163_v37 = vpop.f32.mrb[55].mxu1  ;;  %v2799_v49 = vmul.u32.u64.low 3817748708, %v2791_v50  ;;  %v2800_v58 = vmul.u32.u64.high 3817748708, %v2791_v50, %v2799_v49  ;;  %v2842_v36 = vsub.s32 %v1552_v44, %v1578_v21 }
 0x154   : > { %v2839_v33 = vmul.u32.u64.low 3817748708, %v2826_v9  ;;  %v2840_v35 = vmul.u32.u64.high 3817748708, %v2826_v9, %v2839_v33 }
 0x155   : > { %v1566_v18 = vshrl.u32 %v2800_v58, 3  ;;  %vm1660_vm7 = vcmp.ne.s32.totalorder %v2842_v36, 0  ;;  %vm1669_vm9 = vcmp.lt.s32.totalorder %v2842_v36, 0  ;;  %v1610_v58 = vshrl.u32 %v2833_v60, 3 }
 0x156   : > { %vm2863_vm10 = vmand %vm1669_vm9, %vm1660_vm7 }
 0x157   : > { %v1145_v51 = vpop.f32.mrb[56].mxu0  ;;  %v1567_v31 = vmul.u32 9, %v1566_v18 }
 0x158   : > { %v1006_v20 = vpop.f32.mrb[56].mxu1  ;;  %v2793_v40 = vadd.f32 %v1145_v51, %v1030_v29  ;;  %v2184_v42 = vpop.f32.mrb[57].mxu0 }
 0x159   : > { %v1032_v39 = vadd.f32 %v1006_v20, %v893_v11  ;;  %v2166_v46 = vpop.f32.mrb[57].mxu1  ;;  %v1148_v45 = vpop.f32.mrb[58].mxu0  ;;  %v1568_v29 = vsub.s32 %v2791_v50, %v1567_v31 }
 0x15a   : > { %v1009_v57 = vpop.f32.mrb[58].mxu1  ;;  %v2796_v5 = vadd.f32 %v1148_v45, %v1031_v19  ;;  %v2185_v38 = vpop.f32.mrb[59].mxu0 }
 0x15b   : > { %v1033_v0 = vadd.f32 %v1009_v57, %v894_v13  ;;  %v2167_v10 = vpop.f32.mrb[59].mxu1  ;;  %vm1659_vm5 = vcmp.ne.s32.totalorder %v1568_v29, 0  ;;  %vm1668_vm6 = vcmp.lt.s32.totalorder %v1568_v29, 0 }
 0x15c   : > { %vm2850_vm8 = vmand %vm1668_vm6, %vm1659_vm5 }
 0x15f   : > { %v1153_v47 = vpop.f32.mrb[60].mxu0 }
 0x160   : > { %v1014_v12 = vpop.f32.mrb[60].mxu1  ;;  %v2805_v2 = vadd.f32 %v1153_v47, %v1032_v39  ;;  %v2188_v11 = vpop.f32.mrb[61].mxu0  ;;  %v1686_v39 = vadd.s32 9, %v1568_v29  ;;  %v1687_v47 = vadd.s32 9, %v2842_v36 }
 0x161   : > { %v1034_v4 = vadd.f32 %v1014_v12, %v895_v30  ;;  %v2170_v15 = vpop.f32.mrb[61].mxu1  ;;  %v1156_v16 = vpop.f32.mrb[62].mxu0  ;;  %v2819_v59 = vmul.u32.u64.low 3817748708, %v1554_v17  ;;  %v2820_v30 = vmul.u32.u64.high 3817748708, %v1554_v17, %v2819_v59 }
 0x162   : > { %v1017_v7 = vpop.f32.mrb[62].mxu1  ;;  %v2811_v6 = vadd.f32 %v1156_v16, %v1033_v0  ;;  %v2189_v13 = vpop.f32.mrb[63].mxu0  ;;  %v1695_v12 = vsel %vm2850_vm8, %v1686_v39, %v1568_v29  ;;  %v1696_v18 = vsel %vm2863_vm10, %v1687_v47, %v2842_v36  ;;  %v2947_v36 = vadd.s32 64, %v2791_v50 }
 0x163   : > { %v1035_v53 = vadd.f32 %v1017_v7, %v896_v48  ;;  %v2171_v14 = vpop.f32.mrb[63].mxu1  ;;  %v1599_v19 = vshrl.u32 %v2820_v30, 3  ;;  %v2875_v7 = vld [vmem:[%s3111_s2] ss:$0 sm:$0xff]  ;;  %vm2877_vm11 = vcmp.lt.s32.totalorder %v1695_v12, 8  ;;  %vm2940_vm4 = vcmp.lt.s32.totalorder %v1696_v18, 8 }
 0x165   : > { %v1600_v49 = vmul.u32 9, %v1599_v19 }
 0x167   : > { %v1161_v32 = vpop.f32.mrb[64].mxu0  ;;  %v2870_v15 = vsub.s32 %v1554_v17, %v1600_v49 }
 0x168   : > { %v1022_v22 = vpop.f32.mrb[64].mxu1  ;;  %v2828_v48 = vadd.f32 %v1161_v32, %v1034_v4  ;;  %v2192_v23 = vpop.f32.mrb[65].mxu0 }
 0x169   : > { %v1036_v24 = vadd.f32 %v1022_v22, %v2785_v55  ;;  %v1164_v34 = vpop.f32.mrb[66].mxu0  ;;  %v2174_v1 = vpop.f32.mrb[65].mxu1  ;;  %v1588_v55 = vshrl.u32 %v2817_v62, 3  ;;  %vm1662_vm15 = vcmp.ne.s32.totalorder %v2870_v15, 0  ;;  %vm1671_vm0 = vcmp.lt.s32.totalorder %v2870_v15, 0 }
 0x16a   : > { %v2835_v63 = vadd.f32 %v1164_v34, %v1035_v53  ;;  %v2193_v28 = vpop.f32.mrb[67].mxu0  ;;  %v1025_v54 = vpop.f32.mrb[66].mxu1  ;;  %v2908_v34 = vld [vmem:[%s3112_s3] ss:$0 sm:$0xff]  ;;  %vm2931_vm3 = vmand %vm1671_vm0, %vm1662_vm15 }
 0x16b   : > { %v2175_v25 = vpop.f32.mrb[67].mxu1  ;;  %v1589_v46 = vmul.u32 9, %v1588_v55 }
 0x16d   : > { %v2868_v4 = vsub.s32 %v2808_v56, %v1589_v46  ;;  %v2885_v56 = vadd.s32 48, %v2791_v50 }
 0x16f   : > { %v1169_v37 = vpop.f32.mrb[68].mxu0  ;;  %vm1661_vm12 = vcmp.ne.s32.totalorder %v2868_v4, 0  ;;  %vm1670_vm13 = vcmp.lt.s32.totalorder %v2868_v4, 0  ;;  %v2923_v28 = vmul.u32.u64.low 3817748708, %v2885_v56  ;;  %v2924_v54 = vmul.u32.u64.high 3817748708, %v2885_v56, %v2923_v28 }
 0x170   : > { %v2846_v51 = vadd.f32 %v1169_v37, %v1036_v24  ;;  %v1286_v20 = vpop.f32.mrb[68].mxu1  ;;  %v2196_v42 = vpop.f32.mrb[69].mxu0  ;;  %v2900_v24 = vadd.s32 9, %v2868_v4  ;;  %vm2915_vm2 = vmand %vm1670_vm13, %vm1661_vm12 }
 0x171   : > { %v1324_v45 = vadd.f32 %v1286_v20, %v2787_v41  ;;  %v2202_v57 = vpop.f32.mrb[69].mxu1  ;;  %v1172_v44 = vpop.f32.mrb[70].mxu0  ;;  %v1621_v41 = vshrl.u32 %v2840_v35, 3  ;;  %v2936_v33 = vmul.u32.u64.low 3817748708, %v2890_v43  ;;  %v2937_v35 = vmul.u32.u64.high 3817748708, %v2890_v43, %v2936_v33 }
 0x172   : > { %v1289_v0 = vpop.f32.mrb[70].mxu1  ;;  %v2197_v10 = vpop.f32.mrb[71].mxu0  ;;  %v1697_v20 = vsel %vm2915_vm2, %v2900_v24, %v2868_v4 }
 0x173   : > { %v1325_v3 = vadd.f32 %v1289_v0, %v2789_v26  ;;  %v2203_v52 = vpop.f32.mrb[71].mxu1  ;;  %v1611_v26 = vmul.u32 9, %v1610_v58  ;;  %v1622_v53 = vmul.u32 9, %v1621_v41 }
 0x174   : > { %v2978_v47 = vmul.u32.u64.low 3817748708, %v2947_v36  ;;  %v2979_v41 = vmul.u32.u64.high 3817748708, %v2947_v36, %v2978_v47 }
 0x175   : > { %v2896_v31 = vsub.s32 %v2823_v61, %v1611_v26  ;;  %v2920_v60 = vsub.s32 %v2826_v9, %v1622_v53 }
 0x177   : > { %v1397_v16 = vpop.f32.mrb[72].mxu0  ;;  %vm1663_vm5 = vcmp.ne.s32.totalorder %v2896_v31, 0  ;;  %vm1672_vm6 = vcmp.lt.s32.totalorder %v2896_v31, 0  ;;  %v1690_v46 = vadd.s32 9, %v2896_v31  ;;  %vm1664_vm7 = vcmp.ne.s32.totalorder %v2920_v60, 0 }
 0x178   : > { %v1294_v17 = vpop.f32.mrb[72].mxu1  ;;  %v1435_v14 = vadd.f32 %v1397_v16, %v1324_v45  ;;  %v2224_v8 = vpop.f32.mrb[73].mxu0  ;;  %vm1673_vm8 = vcmp.lt.s32.totalorder %v2920_v60, 0  ;;  %vm2966_vm9 = vmand %vm1672_vm6, %vm1663_vm5  ;;  %v1691_v52 = vadd.s32 9, %v2920_v60 }
 0x179   : > { %v1326_v62 = vadd.f32 %v1294_v17, %v2793_v40  ;;  %v2206_v59 = vpop.f32.mrb[73].mxu1  ;;  %v1400_v30 = vpop.f32.mrb[74].mxu0  ;;  %v2903_v40 = vadd.s32 9, %v2870_v15  ;;  %v1699_v17 = vsel %vm2966_vm9, %v1690_v46, %v2896_v31  ;;  %vm3001_vm10 = vmand %vm1673_vm8, %vm1664_vm7 }
 0x17a   : > { %v1451_v32 = vadd.f32 %v2875_v7, %v1435_v14  ;;  %v1297_v22 = vpop.f32.mrb[74].mxu1  ;;  %v1436_v23 = vadd.f32 %v1400_v30, %v1325_v3  ;;  %v2225_v21 = vpop.f32.mrb[75].mxu0  ;;  %v1632_v14 = vshrl.u32 %v2924_v54, 3  ;;  %v1643_v59 = vshrl.u32 %v2937_v35, 3 }
 0x17b   : > { %v1327_v61 = vadd.f32 %v1297_v22, %v2796_v5  ;;  %v2207_v1 = vpop.f32.mrb[75].mxu1  ;;  %v1698_v39 = vsel %vm2931_vm3, %v2903_v40, %v2870_v15  ;;  %vm3016_vm13 = vcmp.lt.s32.totalorder %v1699_v17, 8  ;;  %v1700_v33 = vsel %vm3001_vm10, %v1691_v52, %v2920_v60 }
 0x17c   : > { %v1470_v29 = vmin.f32 %v1451_v32, 0.0  ;;  %v1452_v25 = vadd.f32 %v2875_v7, %v1436_v23  ;;  %v1460_v55 = vmax.f32 %v1451_v32, 0.0  ;;  %vm3012_vm12 = vcmp.lt.s32.totalorder %v1698_v39, 8 }
 0x17d   : > { %v1633_v28 = vmul.u32 9, %v1632_v14  ;;  %v1644_v35 = vmul.u32 9, %v1643_v59  ;;  %vm3035_vm15 = vcmp.lt.s32.totalorder %v1700_v33, 8 }
 0x17e   : > { %v1485_v19 = vmul.f32 %v2908_v34, %v1470_v29  ;;  %v1471_v37 = vmin.f32 %v1452_v25, 0.0  ;;  %v1461_v45 = vmax.f32 %v1452_v25, 0.0 }
 0x17f   : > { %v1405_v42 = vpop.f32.mrb[76].mxu0  ;;  %v1634_v58 = vsub.s32 %v2885_v56, %v1633_v28 }
 0x180   : > { %v1494_v50 = vadd.f32 %v1485_v19, %v1460_v55  ;;  %v1486_v57 = vmul.f32 %v2908_v34, %v1471_v37  ;;  %v1302_v44 = vpop.f32.mrb[76].mxu1  ;;  %v1437_v38 = vadd.f32 %v1405_v42, %v1326_v62  ;;  %v2228_v49 = vpop.f32.mrb[77].mxu0  ;;  %v1654_v42 = vshrl.u32 %v2979_v41, 3 }
 0x181   : > { %v1328_v0 = vadd.f32 %v1302_v44, %v2805_v2  ;;  %v2210_v10 = vpop.f32.mrb[77].mxu1  ;;  %v1408_v3 = vpop.f32.mrb[78].mxu0  ;;  %vm1665_vm0 = vcmp.ne.s32.totalorder %v1634_v58, 0  ;;  %vm1674_vm2 = vcmp.lt.s32.totalorder %v1634_v58, 0 }
 0x182   : > { %v1981_v12 = vpack.c.bf16 %v1494_v50, %v1494_v50  ;;  %v1731_v11 = vsel %vm2877_vm11, %v1494_v50, 0.0  ;;  %v1495_v4 = vadd.f32 %v1486_v57, %v1461_v45  ;;  %v1453_v15 = vadd.f32 %v2875_v7, %v1437_v38  ;;  %v1305_v26 = vpop.f32.mrb[78].mxu1  ;;  %v2229_v16 = vpop.f32.mrb[79].mxu0  ;;  %vm3054_vm5 = vmand %vm1674_vm2, %vm1665_vm0 }
 0x183   : > { %v1329_v2 = vadd.f32 %v1305_v26, %v2811_v6  ;;  %v1438_v18 = vadd.f32 %v1408_v3, %v1327_v61  ;;  %v2211_v53 = vpop.f32.mrb[79].mxu1  ;;  %v1741_v30 = vsel %vm1740_vm1, %v1731_v11, 0.0  ;;  %vm3008_vm11 = vcmp.lt.s32.totalorder %v1697_v20, 8 }
 0x184   : > { %1541 = vst.msk [vmem:[%s2973_s26] sm:$0xf] %vm1540_vm14, %v1981_v12  ;;  %v1982_v13 = vpack.c.bf16 %v1495_v4, %v1495_v4  ;;  %v1732_v8 = vsel %vm2940_vm4, %v1495_v4, 0.0  ;;  %v1472_v62 = vmin.f32 %v1453_v15, 0.0  ;;  %v1462_v23 = vmax.f32 %v1453_v15, 0.0 }
 0x185   : > { %v1742_v6 = vsel %vm1740_vm1, %v1732_v8, 0.0  ;;  %v1454_v32 = vadd.f32 %v2875_v7, %v1438_v18  ;;  %v1655_v12 = vmul.u32 9, %v1654_v42 }
 0x186   : > { %1542 = vst.msk [vmem:[%s2973_s26 + $0x4] sm:$0xf] %vm1540_vm14, %v1982_v13  ;;  %v1743_v22 = vadd.f32 %v1742_v6, %v1741_v30  ;;  %v1487_v21 = vmul.f32 %v2908_v34, %v1472_v62 }
 0x187   : > { %v1473_v40 = vmin.f32 %v1454_v32, 0.0  ;;  %v1413_v1 = vpop.f32.mrb[80].mxu0  ;;  %v1463_v9 = vmax.f32 %v1454_v32, 0.0  ;;  %v1656_v30 = vsub.s32 %v2947_v36, %v1655_v12 }
 0x188   : > { %v1496_v54 = vadd.f32 %v1487_v21, %v1462_v23  ;;  %v1310_v29 = vpop.f32.mrb[80].mxu1  ;;  %v1439_v25 = vadd.f32 %v1413_v1, %v1328_v0  ;;  %v2232_v5 = vpop.f32.mrb[81].mxu0 }
 0x189   : > { %v1488_v55 = vmul.f32 %v2908_v34, %v1473_v40  ;;  %v1330_v19 = vadd.f32 %v1310_v29, %v2828_v48  ;;  %v2214_v37 = vpop.f32.mrb[81].mxu1  ;;  %v1416_v20 = vpop.f32.mrb[82].mxu0  ;;  %vm1667_vm7 = vcmp.ne.s32.totalorder %v1656_v30, 0  ;;  %vm1676_vm8 = vcmp.lt.s32.totalorder %v1656_v30, 0 }
 0x18a   : > { %v1983_v39 = vpack.c.bf16 %v1496_v54, %v1496_v54  ;;  %v1733_v46 = vsel %vm3008_vm11, %v1496_v54, 0.0  ;;  %v1455_v50 = vadd.f32 %v2875_v7, %v1439_v25  ;;  %v1313_v45 = vpop.f32.mrb[82].mxu1  ;;  %v1440_v57 = vadd.f32 %v1416_v20, %v1329_v2  ;;  %v2233_v60 = vpop.f32.mrb[83].mxu0  ;;  %vm3083_vm10 = vmand %vm1676_vm8, %vm1667_vm7 }
 0x18b   : > { %v1744_v44 = vsel %vm1740_vm1, %v1733_v46, 0.0  ;;  %v1497_v38 = vadd.f32 %v1488_v55, %v1463_v9  ;;  %v1331_v49 = vadd.f32 %v1313_v45, %v2835_v63  ;;  %v2215_v48 = vpop.f32.mrb[83].mxu1  ;;  %v1645_v63 = vsub.s32 %v2890_v43, %v1644_v35 }
 0x18c   : > { %1543 = vst.msk [vmem:[%s2973_s26 + $0x8] sm:$0xf] %vm1540_vm14, %v1983_v39  ;;  %v1745_v0 = vadd.f32 %v1744_v44, %v1743_v22  ;;  %v1474_v10 = vmin.f32 %v1455_v50, 0.0  ;;  %v1456_v3 = vadd.f32 %v2875_v7, %v1440_v57  ;;  %v1464_v56 = vmax.f32 %v1455_v50, 0.0 }
 0x18d   : > { %v1984_v47 = vpack.c.bf16 %v1497_v38, %v1497_v38  ;;  %v1734_v41 = vsel %vm3012_vm12, %v1497_v38, 0.0  ;;  %v1692_v2 = vadd.s32 9, %v1634_v58  ;;  %vm1666_vm3 = vcmp.ne.s32.totalorder %v1645_v63, 0 }
 0x18e   : > { %v1746_v11 = vsel %vm1740_vm1, %v1734_v41, 0.0  ;;  %v1489_v4 = vmul.f32 %v2908_v34, %v1474_v10  ;;  %v1475_v15 = vmin.f32 %v1456_v3, 0.0  ;;  %v1465_v53 = vmax.f32 %v1456_v3, 0.0 }
 0x18f   : > { %1544 = vst.msk [vmem:[%s2973_s26 + $0xc] sm:$0xf] %vm1540_vm14, %v1984_v47  ;;  %v1747_v26 = vadd.f32 %v1746_v11, %v1745_v0  ;;  %v1421_v16 = vpop.f32.mrb[84].mxu0  ;;  %vm1675_vm4 = vcmp.lt.s32.totalorder %v1645_v63, 0  ;;  %v1693_v36 = vadd.s32 9, %v1645_v63  ;;  %v1701_v5 = vsel %vm3054_vm5, %v1692_v2, %v1634_v58 }
 0x190   : > { %v1498_v18 = vadd.f32 %v1489_v4, %v1464_v56  ;;  %v1490_v17 = vmul.f32 %v2908_v34, %v1475_v15  ;;  %v1318_v14 = vpop.f32.mrb[84].mxu1  ;;  %v1441_v43 = vadd.f32 %v1421_v16, %v1330_v19  ;;  %v2236_v13 = vpop.f32.mrb[85].mxu0  ;;  %vm3065_vm6 = vmand %vm1675_vm4, %vm1666_vm3  ;;  %vm3078_vm9 = vcmp.lt.s32.totalorder %v1701_v5, 8 }
 0x191   : > { %v1332_v8 = vadd.f32 %v1318_v14, %v2846_v51  ;;  %v1424_v62 = vpop.f32.mrb[86].mxu0  ;;  %v2218_v59 = vpop.f32.mrb[85].mxu1  ;;  %v1702_v37 = vsel %vm3065_vm6, %v1693_v36, %v1645_v63  ;;  %v1694_v46 = vadd.s32 9, %v1656_v30 }
 0x192   : > { %v1985_v6 = vpack.c.bf16 %v1498_v18, %v1498_v18  ;;  %v1735_v32 = vsel %vm3016_vm13, %v1498_v18, 0.0  ;;  %v1499_v31 = vadd.f32 %v1490_v17, %v1465_v53  ;;  %v1457_v22 = vadd.f32 %v2875_v7, %v1441_v43  ;;  %v2237_v51 = vpop.f32.mrb[87].mxu0  ;;  %v1321_v21 = vpop.f32.mrb[86].mxu1 }
 0x193   : > { %v1748_v24 = vsel %vm1740_vm1, %v1735_v32, 0.0  ;;  %v1442_v40 = vadd.f32 %v1424_v62, %v1331_v49  ;;  %v2219_v61 = vpop.f32.mrb[87].mxu1  ;;  %vm1711_vm11 = vcmp.lt.s32.totalorder %v1702_v37, 8  ;;  %v1703_v47 = vsel %vm3083_vm10, %v1694_v46, %v1656_v30 }
 0x194   : > { %1545 = vst.msk [vmem:[%s2973_s26 + $0x10] sm:$0xf] %vm1540_vm14, %v1985_v6  ;;  %v1749_v1 = vadd.f32 %v1748_v24, %v1747_v26  ;;  %v1986_v27 = vpack.c.bf16 %v1499_v31, %v1499_v31  ;;  %v1736_v28 = vsel %vm3035_vm15, %v1499_v31, 0.0  ;;  %v1476_v25 = vmin.f32 %v1457_v22, 0.0 }
 0x195   : > { %v1750_v29 = vsel %vm1740_vm1, %v1736_v28, 0.0  ;;  %v1458_v33 = vadd.f32 %v2875_v7, %v1442_v40  ;;  %v1466_v9 = vmax.f32 %v1457_v22, 0.0  ;;  %vm1712_vm12 = vcmp.lt.s32.totalorder %v1703_v47, 8 }
 0x196   : > { %1546 = vst.msk [vmem:[%s2973_s26 + $0x14] sm:$0xf] %vm1540_vm14, %v1986_v27  ;;  %v1751_v35 = vadd.f32 %v1750_v29, %v1749_v1  ;;  %v1491_v55 = vmul.f32 %v2908_v34, %v1476_v25  ;;  %vm1764_vm13 = vcmask 122880  }
 0x197   : > { %v1477_v19 = vmin.f32 %v1458_v33, 0.0  ;;  %v1429_v20 = vpop.f32.mrb[88].mxu0  ;;  %v1467_v57 = vmax.f32 %v1458_v33, 0.0 }
 0x198   : > { %v1443_v39 = vadd.f32 %v1429_v20, %v1332_v8  ;;  %v2240_v50 = vpop.f32.mrb[89].mxu0  ;;  %v1500_v45 = vadd.f32 %v1491_v55, %v1466_v9 }
 0x199   : > { %v1492_v60 = vmul.f32 %v2908_v34, %v1477_v19  ;;  %v1432_v38 = vpop.f32.mrb[90].mxu0 }
 0x19a   : > { %v1459_v49 = vadd.f32 %v2875_v7, %v1443_v39  ;;  %v2241_v48 = vpop.f32.mrb[91].mxu0  ;;  %v1987_v58 = vpack.c.bf16 %v1500_v45, %v1500_v45  ;;  %v1737_v0 = vsel %vm3078_vm9, %v1500_v45, 0.0 }
 0x19b   : > { %v1501_v10 = vadd.f32 %v1492_v60, %v1467_v57  ;;  %v1752_v3 = vsel %vm1740_vm1, %v1737_v0, 0.0 }
 0x19c   : > { %v1478_v52 = vmin.f32 %v1459_v49, 0.0  ;;  %1547 = vst.msk [vmem:[%s2973_s26 + $0x18] sm:$0xf] %vm1540_vm14, %v1987_v58  ;;  %v1753_v41 = vadd.f32 %v1752_v3, %v1751_v35  ;;  %v1468_v11 = vmax.f32 %v1459_v49, 0.0 }
 0x19d   : > { %v1988_v63 = vpack.c.bf16 %v1501_v10, %v1501_v10  ;;  %v1738_v12 = vsel %vm1711_vm11, %v1501_v10, 0.0 }
 0x19e   : > { %v1754_v7 = vsel %vm1740_vm1, %v1738_v12, 0.0  ;;  %v1493_v56 = vmul.f32 %v2908_v34, %v1478_v52 }
 0x19f   : > { %1548 = vst.msk [vmem:[%s2973_s26 + $0x1c] sm:$0xf] %vm1540_vm14, %v1988_v63  ;;  %v1755_v4 = vadd.f32 %v1754_v7, %v1753_v41 }
 0x1a0   : > { %v1502_v15 = vadd.f32 %v1493_v56, %v1468_v11 }
 0x1a2   : > { %v1989_v26 = vpack.c.bf16 %v1502_v15, %v1502_v15  ;;  %v1739_v16 = vsel %vm1712_vm12, %v1502_v15, 0.0 }
 0x1a3   : > { %v1756_v2 = vsel %vm1740_vm1, %v1739_v16, 0.0 }
 0x1a4   : > { %1549 = vst.msk [vmem:[%s2973_s26 + $0x20] sm:$0xf] %vm1540_vm14, %v1989_v26  ;;  %v1757_v18 = vadd.f32 %v1756_v2, %v1755_v4 }
 0x1a6   : > { %v1758_v53 = vrot.slane %v1757_v18, 4 }
 0x1a8   : > { %v1759_v17 = vadd.f32 %v1758_v53, %v1757_v18 }
 0x1aa   : > { %v1760_v14 = vrot.slane %v1759_v17, 2 }
 0x1ac   : > { %v1761_v43 = vadd.f32 %v1760_v14, %v1759_v17 }
 0x1ae   : > { %v1762_v13 = vrot.slane %v1761_v43, 1 }
 0x1b0   : > { %v1763_v34 = vadd.f32 %v1762_v13, %v1761_v43 }
 0x1b2   : > { %1765 = vst.msk [vmem:[%s233_s29] sm:$0x1] %vm1764_vm13, %v1763_v34 }
 0x1b3 PF: > { %s16_s18 = sadd.s32 1, %s2312_s18  }
 0x1b4   : > { %p13_p4 = scmp.ge.s32.totalorder %s16_s18, 4  }
 0x1b6   :  { %15 = sbr.rel (!%p13_p4) target bundleno = 1 (0x1), region = 89 }

// kernel: conv2_forward.3
= control target key start
LH: loop header
LB: loop body
LE: loop exit
PB: predicated region body
PF: predicated region fallthrough
CT: control target
= control target key end

     0   :  { %s1632_s15 = smov 0   ;;  %s1634_s16 = smov 0   ;;  %s1926_s0 = inlined_call_operand.vmem [shape: bf16[2,2,68,16], index: 0, kind: input, shape index: {}]   ;;  %s1927_s1 = inlined_call_operand.vmem [shape: bf16[2,9,16,16], index: 1, kind: input, shape index: {}]   ;;  %s1928_s2 = inlined_call_operand.vmem [shape: f32[1,16], index: 2, kind: input, shape index: {}]   ;;  %s1929_s3 = inlined_call_operand.vmem [shape: f32[1,16], index: 3, kind: input, shape index: {}]   ;;  %s1930_s4 = inlined_call_operand.vmem [shape: bf16[2,2,40,16], index: 4, kind: output, shape index: {}]  }
   0x1   :  { %s1636_s17 = smov 0   ;;  %s1638_s18 = smov 0  }
   0x2   :  { %s1640_s19 = smov 0  }
   0x3 LB: > { %s23_s20 = sadd.s32 1, %s1595_s17  ;;  %s26_s21 = sadd.s32 1, %s1599_s18  ;;  %s1603_s19 = sphi %s1640_s19, %s14_s19   ;;  %s1599_s18 = sphi %s1638_s18, %s1934_s18   ;;  %s1595_s17 = sphi %s1636_s17, %s1933_s17   ;;  %s1591_s16 = sphi %s1634_s16, %s1932_s16   ;;  %s1587_s15 = sphi %s1632_s15, %s1931_s15  }
   0x4   : > { %p24_p0 = scmp.ge.s32.totalorder %s23_s20, 2  ;;  %p1259_p1 = scmp.ge.s32.totalorder %s1603_s19, 1 }
   0x5   : > { %p192_p2 = scmp.lt.s32.totalorder %s1603_s19, 5 }
   0x6   : > { %s1936_s20 = smov (%p24_p0, %s23_s20), 0  ;;  %s1938_s21 = smov (!%p24_p0, %s26_s21), %s1599_s18 }
   0x7   : > { %p193_p3 = pnand %p1259_p1, %p192_p2  ;;  %p28_p4 = scmp.ge.s32.totalorder %s1938_s21, 2 }
   0x8   : > { %p231_p5 = scmp.lt.s32.totalorder (!%p193_p3), %s1591_s16, 1  ;;  %p233_p6 = scmp.lt.s32.totalorder (!%p193_p3), %s1587_s15, 1  ;;  %v1605_v0 = vmov (!%p193_p3), 0.0   ;;  %vm1606_vm0 = vmmov (!%p193_p3), 0   ;;  %vm283_vm1 = vsmask.f32 (!%p193_p3), 7424 }
   0x9   : > { %s1940_s21 = smov (%p28_p4, %s1938_s21), 0  ;;  %196 = sbr.rel (%p193_p3) target bundleno = 365 (0x16d), region = 36 }
   0xa   : > { %1499 = vmatprep.subr.bf16.mxu1 (!%p193_p3), %v1605_v0  ;;  %1379 = vmatprep.mubr.msk.bf16.mxu1 (!%p193_p3), %vm1606_vm0, %v1605_v0  ;;  %vm313_vm2 = vcmask (!%p193_p3), 130048   ;;  %vm452_vm3 = vcmask (!%p193_p3), 1046528   ;;  %vm1000_vm4 = vcmask (!%p193_p3), 1044480   ;;  %vm904_vm5 = vsmask.f32 (!%p193_p3), 5376 }
   0xb   : > { %1373 = vmatprep.subr.bf16.mxu0 (!%p193_p3), %v1605_v0  ;;  %1375 = vmatprep.mubr.msk.bf16.mxu0 (!%p193_p3), %vm1606_vm0, %v1605_v0  ;;  %vm626_vm6 = vsmask.f32 (!%p193_p3), 6400  ;;  %vm732_vm7 = vcmask (!%p193_p3), 1045504   ;;  %vm1142_vm8 = vcmask (!%p193_p3), 125952  }
  0x10   : > { %s1942_s16 = smov (!%p231_p5, %s1591_s16), 1  ;;  %s1944_s15 = smov (!%p233_p6, %s1587_s15), 1 }
  0x11   : > { %s1503_s22 = smul.u32 72, %s1942_s16 }
  0x12   : > { %s1501_s23 = smul.u32 9, %s1944_s15 }
  0x13   : > { %s1677_s26 = scalar_lea.vmem %s1927_s1, %s1503_s22  ;;  %s1502_s27 = smul.u32 18, %s1942_s16 }
  0x14   : > { %v1548_v1 = vld [vmem:[%s1677_s26 + $0x8] sm:$0xff]   ;;  %v1551_v20 = vld [vmem:[%s1677_s26] sm:$0xff]   ;;  %v1554_v22 = vld [vmem:[%s1677_s26 + $0x10] sm:$0xff]   ;;  %s1504_s7 = smul.u32 5, %s1944_s15 }
  0x15   : > { %s237_s28 = sadd.s32 %s1502_s27, %s1501_s23  ;;  %1500 = vmatpush3.bf16.msra.mxu1 %v1548_v1  ;;  %1374 = vmatpush3.bf16.msra.mxu0 %v1548_v1  ;;  %v1556_v37 = vld [vmem:[%s1677_s26 + $0x20] sm:$0xff]   ;;  %v1555_v52 = vld [vmem:[%s1677_s26 + $0x18] sm:$0xff]   ;;  %s1505_s8 = smul.u32 10, %s1942_s16 }
  0x16   : > { %s1260_s29 = sshll.u32 %s237_s28, 2  ;;  %1387 = vmatprep.subr.bf16.mxu1 %v1605_v0  ;;  %1401 = vmatprep.subr.bf16.mxu0 %v1605_v0 }
  0x17   : > { %s1685_s6 = scalar_lea.vmem %s1926_s0, %s1260_s29  ;;  %s251_s11 = sadd.s32 %s1505_s8, %s1504_s7 }
  0x18   : > { %v1689_v2 = vld [vmem:[%s1685_s6 + $0x8] sm:$0xf]  ;;  %v1692_v3 = vld [vmem:[%s1685_s6 + $0xc] sm:$0xf]  ;;  %v1695_v4 = vld [vmem:[%s1685_s6 + $0x10] sm:$0xf] }
  0x19   : > { %v1698_v5 = vld [vmem:[%s1685_s6 + $0x14] sm:$0xf]  ;;  %v1702_v6 = vcombine.low %v1689_v2, %v1692_v3  ;;  %v255_v7 = vld [vmem:[%s1685_s6] sm:$0xf]  ;;  %v1706_v8 = vld [vmem:[%s1685_s6 + $0x4] sm:$0xf]  ;;  %v1768_v53 = vcombine.low %v1692_v3, %v1695_v4 }
  0x1a   : > { %v1710_v9 = vcombine.low %v1695_v4, %v1698_v5  ;;  %v1713_v10 = vcombine.low %v255_v7, %v1706_v8  ;;  %v262_v28 = vld [vmem:[%s1685_s6 + $0x1c] sm:$0xf]  ;;  %v261_v34 = vld [vmem:[%s1685_s6 + $0x18] sm:$0xf]  ;;  %v1776_v55 = vcombine.low %v1706_v8, %v1689_v2  ;;  %s1262_s14 = sshll.u32 %s251_s11, 2 }
  0x1b   : > { %v292_v11 = vshll.u32 %v1702_v6, 16  ;;  %v296_v12 = vshrl.u32 %v1702_v6, 16  ;;  %v454_v27 = vrot.slane %v1702_v6, 1  ;;  %v1735_v35 = vcombine.low %v261_v34, %v262_v28  ;;  %v1562_v28 = vld [vmem:[%s1677_s26 + $0x38] sm:$0xff]   ;;  %s1899_s22 = scalar_lea.vmem %s1930_s4, %s1262_s14 }
  0x1c   : > { %v300_v13 = vshll.u32 %v1710_v9, 16  ;;  %v285_v14 = vshrl.u32 %v1713_v10, 16  ;;  %v287_v15 = vshll.u32 %v1713_v10, 16  ;;  %v304_v25 = vshrl.u32 %v1710_v9, 16 }
  0x1d   : > { %v294_v16 = vrot.slane %v292_v11, 1  ;;  %v453_v26 = vrot.slane %v1713_v10, 1  ;;  %v905_v29 = vrot.slane %v296_v12, 2  ;;  %v906_v30 = vrot.slane %v292_v11, 3 }
  0x1e   : > { %v302_v17 = vrot.slane %v300_v13, 1  ;;  %v289_v18 = vrot.slane %v287_v15, 1  ;;  %v909_v31 = vrot.slane %v300_v13, 3  ;;  %v908_v32 = vrot.slane %v304_v25, 2 }
  0x1f   : > { %v298_v19 = vor.u32 %v296_v12, %v294_v16  ;;  %v455_v36 = vsel %vm452_vm3, %v453_v26, %v454_v27  ;;  %v1001_v38 = vrot.slane %v1702_v6, 3  ;;  %v1002_v39 = vrot.slane %v1710_v9, 3  ;;  %v1560_v12 = vld [vmem:[%s1677_s26 + $0x30] sm:$0xff]  }
  0x20   : > { %v290_v21 = vor.u32 %v289_v18, %v285_v14  ;;  %v306_v33 = vor.u32 %v304_v25, %v302_v17  ;;  %v907_v40 = vor.u32 %v906_v30, %v905_v29  ;;  %v910_v41 = vor.u32 %v909_v31, %v908_v32  ;;  %v1559_v18 = vld [vmem:[%s1677_s26 + $0x28] sm:$0xff]   ;;  %v1563_v25 = vld [vmem:[%s1677_s26 + $0x40] sm:$0xff]  }
  0x21   : > { %v303_v23 = vsel %vm283_vm1, %v298_v19, %v302_v17  ;;  %v1004_v42 = vrot.slane %v1735_v35, 3  ;;  %v1744_v43 = vsel %vm1000_vm4, %v1001_v38, %v1002_v39  ;;  %v913_v44 = vshrl.u32 %v1735_v35, 16 }
  0x22   : > { %1380 = vmatmul.mubr.msk.bf16.vlgmr.msra.gmra.mrb[0].mxu1 %vm313_vm2, %v303_v23  ;;  %v295_v24 = vsel %vm283_vm1, %v290_v21, %v294_v16  ;;  %v916_v45 = vshll.u32 %v1735_v35, 16  ;;  %v1752_v46 = vsel %vm904_vm5, %v907_v40, %v910_v41  ;;  %v456_v50 = vrot.slane %v1710_v9, 1 }
  0x23   : > { %1388 = vmatpush3.bf16.msra.mxu1 %v1551_v20  ;;  %1376 = vmatmul.mubr.msk.bf16.vlgmr.msra.gmra.mrb[0].mxu0 %vm313_vm2, %v295_v24  ;;  %v1757_v47 = vsel %vm1000_vm4, %v1002_v39, %v1004_v42  ;;  %v915_v48 = vrot.slane %v913_v44, 2  ;;  %v636_v57 = vshrl.u32 %v1768_v53, 16  ;;  %v628_v58 = vshrl.u32 %v1776_v55, 16 }
  0x24   : > { %1383 = vmatprep.mubr.msk.bf16.mxu1 %vm1606_vm0, %v1605_v0  ;;  %1402 = vmatpush3.bf16.msra.mxu0 %v1554_v22  ;;  %v918_v49 = vrot.slane %v916_v45, 3  ;;  %v457_v56 = vsel %vm452_vm3, %v454_v27, %v456_v50  ;;  %v631_v59 = vshll.u32 %v1776_v55, 16  ;;  %v639_v60 = vshll.u32 %v1768_v53, 16 }
  0x25   : > { %1403 = vmatprep.mubr.msk.bf16.mxu0 %vm1606_vm0, %v1605_v0  ;;  %1415 = vmatprep.subr.bf16.mxu1 %v1605_v0  ;;  %v638_v61 = vrot.slane %v636_v57, 1  ;;  %v630_v62 = vrot.slane %v628_v58, 1  ;;  %v1792_v2 = vcombine.low %v1698_v5, %v261_v34  ;;  %v1272_v5 = vcombine.low %v1695_v4, %v1695_v4 }
  0x26   : > { %1429 = vmatprep.subr.bf16.mxu0 %v1605_v0  ;;  %v1763_v51 = vor.u32 %v918_v49, %v915_v48  ;;  %v633_v63 = vrot.slane %v631_v59, 2  ;;  %v641_v1 = vrot.slane %v639_v60, 2  ;;  %v542_v15 = vrot.slane %v1776_v55, 1 }
  0x27   : > { %v645_v8 = vshrl.u32 %v1792_v2, 16  ;;  %v543_v16 = vrot.slane %v1768_v53, 1  ;;  %v545_v20 = vrot.slane %v1792_v2, 1  ;;  %v820_v22 = vrot.slane %v1702_v6, 2 }
  0x28   : > { %v1772_v54 = vsel %vm904_vm5, %v910_v41, %v1763_v51  ;;  %v634_v3 = vor.u32 %v633_v63, %v630_v62  ;;  %v642_v7 = vor.u32 %v641_v1, %v638_v61  ;;  %v821_v23 = vrot.slane %v1710_v9, 2 }
  0x29   : > { %v647_v13 = vrot.slane %v645_v8, 1  ;;  %v544_v17 = vsel %vm452_vm3, %v542_v15, %v543_v16  ;;  %v546_v21 = vsel %vm452_vm3, %v543_v16, %v545_v20  ;;  %v733_v26 = vrot.slane %v1776_v55, 2 }
  0x2a   : > { %1384 = vmatmul.mubr.msk.bf16.gmra.mrb[4].mxu1 %vm313_vm2, %v306_v33  ;;  %v643_v11 = vsel %vm626_vm6, %v634_v3, %v642_v7  ;;  %v822_v24 = vsel %vm732_vm7, %v820_v22, %v821_v23  ;;  %v734_v27 = vrot.slane %v1768_v53, 2  ;;  %v736_v30 = vrot.slane %v1792_v2, 2 }
  0x2b   : > { %1389 = vmatprep.mubr.msk.bf16.mxu1 %vm1606_vm0, %v1605_v0  ;;  %1404 = vmatmul.mubr.msk.bf16.vlgmr.msra.gmra.mrb[4].mxu0 %vm313_vm2, %v455_v36 }
  0x2c   : > { %1430 = vmatpush3.bf16.msra.mxu0 %v1556_v37  ;;  %1407 = vmatprep.mubr.msk.bf16.mxu0 %vm1606_vm0, %v1605_v0  ;;  %v735_v9 = vsel %vm732_vm7, %v733_v26, %v734_v27  ;;  %v737_v31 = vsel %vm732_vm7, %v734_v27, %v736_v30 }
  0x2d   : > { %1457 = vmatprep.subr.bf16.mxu0 %v1605_v0 }
  0x32   : > { %1390 = vmatmul.mubr.msk.bf16.vlgmr.msra.gmra.mrb[8].mxu1 %vm313_vm2, %v1713_v10  ;;  %v648_v10 = vshll.u32 %v1792_v2, 16 }
  0x33   : > { %1416 = vmatpush3.bf16.msra.mxu1 %v1555_v52  ;;  %1393 = vmatprep.mubr.msk.bf16.mxu1 %vm1606_vm0, %v1605_v0 }
  0x34   : > { %1408 = vmatmul.mubr.msk.bf16.gmra.mrb[8].mxu0 %vm313_vm2, %v457_v56  ;;  %1443 = vmatprep.subr.bf16.mxu1 %v1605_v0  ;;  %v650_v14 = vrot.slane %v648_v10, 2 }
  0x35   : > { %1411 = vmatprep.mubr.msk.bf16.mxu0 %vm1606_vm0, %v1605_v0 }
  0x36   : > { %v651_v4 = vor.u32 %v650_v14, %v647_v13 }
  0x38   : > { %v652_v19 = vsel %vm626_vm6, %v642_v7, %v651_v4 }
  0x3a   : > { %1394 = vmatmul.mubr.msk.bf16.gmra.mrb[12].mxu1 %vm313_vm2, %v1702_v6  ;;  %v823_v6 = vrot.slane %v1735_v35, 2 }
  0x3b   : > { %1397 = vmatprep.mubr.msk.bf16.mxu1 %vm1606_vm0, %v1605_v0 }
  0x3c   : > { %1412 = vmatmul.mubr.msk.bf16.gmra.mrb[12].mxu0 %vm313_vm2, %v456_v50  ;;  %v824_v29 = vsel %vm732_vm7, %v821_v23, %v823_v6 }
  0x3d   : > { %1431 = vmatprep.mubr.msk.bf16.mxu0 %vm1606_vm0, %v1605_v0 }
  0x42   : > { %1398 = vmatmul.mubr.msk.bf16.gmra.mrb[16].mxu1 %vm313_vm2, %v1272_v5 }
  0x43   : > { %1417 = vmatprep.mubr.msk.bf16.mxu1 %vm1606_vm0, %v1605_v0 }
  0x44   : > { %1432 = vmatmul.mubr.msk.bf16.vlgmr.msra.gmra.mrb[16].mxu0 %vm313_vm2, %v643_v11 }
  0x45   : > { %1458 = vmatpush3.bf16.msra.mxu0 %v1560_v12  ;;  %1435 = vmatprep.mubr.msk.bf16.mxu0 %vm1606_vm0, %v1605_v0 }
  0x46   : > { %1485 = vmatprep.subr.bf16.mxu0 %v1605_v0 }
  0x4a   : > { %1418 = vmatmul.mubr.msk.bf16.vlgmr.msra.gmra.mrb[20].mxu1 %vm313_vm2, %v544_v17 }
  0x4b   : > { %1444 = vmatpush3.bf16.msra.mxu1 %v1559_v18  ;;  %1421 = vmatprep.mubr.msk.bf16.mxu1 %vm1606_vm0, %v1605_v0 }
  0x4c   : > { %1436 = vmatmul.mubr.msk.bf16.gmra.mrb[20].mxu0 %vm313_vm2, %v652_v19  ;;  %1471 = vmatprep.subr.bf16.mxu1 %v1605_v0 }
  0x4d   : > { %1439 = vmatprep.mubr.msk.bf16.mxu0 %vm1606_vm0, %v1605_v0 }
  0x52   : > { %1422 = vmatmul.mubr.msk.bf16.gmra.mrb[24].mxu1 %vm313_vm2, %v546_v21 }
  0x53   : > { %1425 = vmatprep.mubr.msk.bf16.mxu1 %vm1606_vm0, %v1605_v0 }
  0x54   : > { %1440 = vmatmul.mubr.msk.bf16.gmra.mrb[24].mxu0 %vm313_vm2, %v651_v4 }
  0x55   : > { %1459 = vmatprep.mubr.msk.bf16.mxu0 %vm1606_vm0, %v1605_v0 }
  0x5a   : > { %1426 = vmatmul.mubr.msk.bf16.gmra.mrb[28].mxu1 %vm313_vm2, %v545_v20 }
  0x5b   : > { %1445 = vmatprep.mubr.msk.bf16.mxu1 %vm1606_vm0, %v1605_v0 }
  0x5c   : > { %1460 = vmatmul.mubr.msk.bf16.vlgmr.msra.gmra.mrb[28].mxu0 %vm313_vm2, %v822_v24 }
  0x5d   : > { %1486 = vmatpush3.bf16.msra.mxu0 %v1563_v25  ;;  %1463 = vmatprep.mubr.msk.bf16.mxu0 %vm1606_vm0, %v1605_v0 }
  0x62   : > { %1446 = vmatmul.mubr.msk.bf16.vlgmr.msra.gmra.mrb[32].mxu1 %vm313_vm2, %v735_v9 }
  0x63   : > { %1472 = vmatpush3.bf16.msra.mxu1 %v1562_v28  ;;  %1449 = vmatprep.mubr.msk.bf16.mxu1 %vm1606_vm0, %v1605_v0 }
  0x64   : > { %1464 = vmatmul.mubr.msk.bf16.gmra.mrb[32].mxu0 %vm313_vm2, %v824_v29 }
  0x65   : > { %1467 = vmatprep.mubr.msk.bf16.mxu0 %vm1606_vm0, %v1605_v0 }
  0x6a   : > { %1450 = vmatmul.mubr.msk.bf16.gmra.mrb[36].mxu1 %vm313_vm2, %v737_v31 }
  0x6b   : > { %1453 = vmatprep.mubr.msk.bf16.mxu1 %vm1606_vm0, %v1605_v0 }
  0x6c   : > { %1468 = vmatmul.mubr.msk.bf16.gmra.mrb[36].mxu0 %vm313_vm2, %v823_v6 }
  0x6d   : > { %1487 = vmatprep.mubr.msk.bf16.mxu0 %vm1606_vm0, %v1605_v0 }
  0x72   : > { %1454 = vmatmul.mubr.msk.bf16.gmra.mrb[40].mxu1 %vm313_vm2, %v736_v30 }
  0x73   : > { %1473 = vmatprep.mubr.msk.bf16.mxu1 %vm1606_vm0, %v1605_v0 }
  0x74   : > { %1488 = vmatmul.mubr.msk.bf16.vlgmr.msra.gmra.mrb[40].mxu0 %vm313_vm2, %v1744_v43 }
  0x75   : > { %1491 = vmatprep.mubr.msk.bf16.mxu0 %vm1606_vm0, %v1605_v0 }
  0x7a   : > { %1474 = vmatmul.mubr.msk.bf16.vlgmr.msra.gmra.mrb[44].mxu1 %vm313_vm2, %v1752_v46 }
  0x7b   : > { %1477 = vmatprep.mubr.msk.bf16.mxu1 %vm1606_vm0, %v1605_v0 }
  0x7c   : > { %1492 = vmatmul.mubr.msk.bf16.gmra.mrb[44].mxu0 %vm313_vm2, %v1757_v47 }
  0x7d   : > { %1495 = vmatprep.mubr.msk.bf16.mxu0 %vm1606_vm0, %v1605_v0 }
  0x82   : > { %1478 = vmatmul.mubr.msk.bf16.gmra.mrb[48].mxu1 %vm313_vm2, %v1772_v54 }
  0x83   : > { %1481 = vmatprep.mubr.msk.bf16.mxu1 %vm1606_vm0, %v1605_v0 }
  0x84   : > { %1496 = vmatmul.mubr.msk.bf16.gmra.mrb[48].mxu0 %vm313_vm2, %v1004_v42 }
  0x8a   : > { %1482 = vmatmul.mubr.msk.bf16.gmra.mrb[52].mxu1 %vm313_vm2, %v1763_v51 }
  0xf5   : > { %v365_v32 = vpop.f32.mrb[0].mxu1 }
  0xf6   : > { %v1381_v33 = vpop.f32.mrb[1].mxu1  ;;  %v357_v34 = vpop.f32.mrb[0].mxu0 }
  0xf7   : > { %v368_v36 = vpop.f32.mrb[2].mxu1  ;;  %v1377_v37 = vpop.f32.mrb[1].mxu0 }
  0xf8   : > { %v1382_v38 = vpop.f32.mrb[3].mxu1  ;;  %v360_v39 = vpop.f32.mrb[2].mxu0 }
  0xf9   : > { %v1378_v40 = vpop.f32.mrb[3].mxu0 }
  0xfd   : > { %v373_v41 = vpop.f32.mrb[4].mxu1 }
  0xfe   : > { %v1385_v43 = vpop.f32.mrb[5].mxu1  ;;  %v507_v44 = vpop.f32.mrb[4].mxu0 }
  0xff   : > { %v376_v45 = vpop.f32.mrb[6].mxu1  ;;  %v1405_v0 = vpop.f32.mrb[5].mxu0 }
 0x100   : > { %v1386_v46 = vpop.f32.mrb[7].mxu1  ;;  %v510_v35 = vpop.f32.mrb[6].mxu0 }
 0x101   : > { %v1406_v47 = vpop.f32.mrb[7].mxu0 }
 0x105   : > { %v427_v42 = vpop.f32.mrb[8].mxu1 }
 0x106   : > { %v428_v48 = vadd.f32 %v427_v42, %v357_v34  ;;  %v1391_v49 = vpop.f32.mrb[9].mxu1 }
 0x107   : > { %v430_v50 = vpop.f32.mrb[10].mxu1  ;;  %v515_v51 = vpop.f32.mrb[8].mxu0 }
 0x108   : > { %v431_v52 = vadd.f32 %v430_v50, %v360_v39  ;;  %v1392_v53 = vpop.f32.mrb[11].mxu1  ;;  %v1409_v54 = vpop.f32.mrb[9].mxu0  ;;  %v529_v55 = vadd.f32 %v507_v44, %v428_v48 }
 0x109   : > { %v518_v56 = vpop.f32.mrb[10].mxu0 }
 0x10a   : > { %v1410_v57 = vpop.f32.mrb[11].mxu0  ;;  %v530_v58 = vadd.f32 %v510_v35, %v431_v52 }
 0x10d   : > { %v435_v59 = vpop.f32.mrb[12].mxu1 }
 0x10e   : > { %v436_v60 = vadd.f32 %v435_v59, %v365_v32  ;;  %v1395_v61 = vpop.f32.mrb[13].mxu1 }
 0x10f   : > { %v438_v62 = vpop.f32.mrb[14].mxu1  ;;  %v523_v63 = vpop.f32.mrb[12].mxu0 }
 0x110   : > { %v439_v1 = vadd.f32 %v438_v62, %v368_v36  ;;  %v1396_v2 = vpop.f32.mrb[15].mxu1  ;;  %v1413_v3 = vpop.f32.mrb[13].mxu0  ;;  %v531_v7 = vadd.f32 %v515_v51, %v436_v60 }
 0x111   : > { %v526_v8 = vpop.f32.mrb[14].mxu0 }
 0x112   : > { %v1414_v10 = vpop.f32.mrb[15].mxu0  ;;  %v532_v5 = vadd.f32 %v518_v56, %v439_v1 }
 0x115   : > { %v443_v11 = vpop.f32.mrb[16].mxu1 }
 0x116   : > { %v444_v12 = vadd.f32 %v443_v11, %v373_v41  ;;  %v1399_v13 = vpop.f32.mrb[17].mxu1 }
 0x117   : > { %v446_v14 = vpop.f32.mrb[18].mxu1  ;;  %v702_v15 = vpop.f32.mrb[16].mxu0 }
 0x118   : > { %v1400_v16 = vpop.f32.mrb[19].mxu1  ;;  %v1433_v4 = vpop.f32.mrb[17].mxu0  ;;  %v533_v17 = vadd.f32 %v523_v63, %v444_v12 }
 0x119   : > { %v705_v18 = vpop.f32.mrb[18].mxu0 }
 0x11a   : > { %v1434_v19 = vpop.f32.mrb[19].mxu0 }
 0x11d   : > { %v596_v20 = vpop.f32.mrb[20].mxu1 }
 0x11e   : > { %v618_v21 = vadd.f32 %v596_v20, %v529_v55  ;;  %v1419_v22 = vpop.f32.mrb[21].mxu1 }
 0x11f   : > { %v599_v23 = vpop.f32.mrb[22].mxu1  ;;  %v710_v24 = vpop.f32.mrb[20].mxu0 }
 0x120   : > { %v619_v25 = vadd.f32 %v599_v23, %v530_v58  ;;  %v1420_v26 = vpop.f32.mrb[23].mxu1  ;;  %v1437_v27 = vpop.f32.mrb[21].mxu0  ;;  %v724_v6 = vadd.f32 %v702_v15, %v618_v21 }
 0x121   : > { %v713_v9 = vpop.f32.mrb[22].mxu0  ;;  %v1323_v27 = vld [vmem:[%s1928_s2] ss:$0 sm:$0xff] }
 0x122   : > { %v1438_v28 = vpop.f32.mrb[23].mxu0  ;;  %v725_v29 = vadd.f32 %v705_v18, %v619_v25 }
 0x125   : > { %v604_v30 = vpop.f32.mrb[24].mxu1 }
 0x126   : > { %v620_v31 = vadd.f32 %v604_v30, %v531_v7  ;;  %v1423_v32 = vpop.f32.mrb[25].mxu1 }
 0x127   : > { %v607_v33 = vpop.f32.mrb[26].mxu1  ;;  %v718_v34 = vpop.f32.mrb[24].mxu0 }
 0x128   : > { %v621_v36 = vadd.f32 %v607_v33, %v532_v5  ;;  %v1424_v37 = vpop.f32.mrb[27].mxu1  ;;  %v1441_v38 = vpop.f32.mrb[25].mxu0  ;;  %v726_v39 = vadd.f32 %v710_v24, %v620_v31 }
 0x129   : > { %v721_v40 = vpop.f32.mrb[26].mxu0  ;;  %v1324_v37 = vld [vmem:[%s1929_s3] ss:$0 sm:$0xff] }
 0x12a   : > { %v1442_v41 = vpop.f32.mrb[27].mxu0  ;;  %v727_v43 = vadd.f32 %v713_v9, %v621_v36 }
 0x12d   : > { %v612_v44 = vpop.f32.mrb[28].mxu1 }
 0x12e   : > { %v622_v45 = vadd.f32 %v612_v44, %v533_v17  ;;  %v1427_v0 = vpop.f32.mrb[29].mxu1 }
 0x12f   : > { %v615_v46 = vpop.f32.mrb[30].mxu1  ;;  %v874_v35 = vpop.f32.mrb[28].mxu0 }
 0x130   : > { %v1428_v47 = vpop.f32.mrb[31].mxu1  ;;  %v1461_v42 = vpop.f32.mrb[29].mxu0  ;;  %v728_v48 = vadd.f32 %v718_v34, %v622_v45 }
 0x131   : > { %v877_v49 = vpop.f32.mrb[30].mxu0 }
 0x132   : > { %v1462_v50 = vpop.f32.mrb[31].mxu0 }
 0x135   : > { %v787_v51 = vpop.f32.mrb[32].mxu1 }
 0x136   : > { %v809_v52 = vadd.f32 %v787_v51, %v724_v6  ;;  %v1447_v53 = vpop.f32.mrb[33].mxu1 }
 0x137   : > { %v790_v54 = vpop.f32.mrb[34].mxu1  ;;  %v882_v55 = vpop.f32.mrb[32].mxu0 }
 0x138   : > { %v810_v56 = vadd.f32 %v790_v54, %v725_v29  ;;  %v1448_v57 = vpop.f32.mrb[35].mxu1  ;;  %v1465_v58 = vpop.f32.mrb[33].mxu0  ;;  %v896_v59 = vadd.f32 %v874_v35, %v809_v52 }
 0x139   : > { %v885_v60 = vpop.f32.mrb[34].mxu0 }
 0x13a   : > { %v1466_v61 = vpop.f32.mrb[35].mxu0  ;;  %v897_v62 = vadd.f32 %v877_v49, %v810_v56 }
 0x13d   : > { %v795_v63 = vpop.f32.mrb[36].mxu1 }
 0x13e   : > { %v811_v1 = vadd.f32 %v795_v63, %v726_v39  ;;  %v1451_v2 = vpop.f32.mrb[37].mxu1 }
 0x13f   : > { %v798_v3 = vpop.f32.mrb[38].mxu1  ;;  %v890_v7 = vpop.f32.mrb[36].mxu0 }
 0x140   : > { %v812_v8 = vadd.f32 %v798_v3, %v727_v43  ;;  %v1452_v10 = vpop.f32.mrb[39].mxu1  ;;  %v1469_v5 = vpop.f32.mrb[37].mxu0  ;;  %v898_v11 = vadd.f32 %v882_v55, %v811_v1 }
 0x141   : > { %v893_v12 = vpop.f32.mrb[38].mxu0 }
 0x142   : > { %v1470_v13 = vpop.f32.mrb[39].mxu0  ;;  %v899_v14 = vadd.f32 %v885_v60, %v812_v8 }
 0x145   : > { %v803_v15 = vpop.f32.mrb[40].mxu1 }
 0x146   : > { %v813_v16 = vadd.f32 %v803_v15, %v728_v48  ;;  %v1455_v4 = vpop.f32.mrb[41].mxu1 }
 0x147   : > { %v806_v17 = vpop.f32.mrb[42].mxu1  ;;  %v1055_v18 = vpop.f32.mrb[40].mxu0 }
 0x148   : > { %v1456_v19 = vpop.f32.mrb[43].mxu1  ;;  %v1489_v20 = vpop.f32.mrb[41].mxu0  ;;  %v900_v21 = vadd.f32 %v890_v7, %v813_v16 }
 0x149   : > { %v1058_v22 = vpop.f32.mrb[42].mxu0 }
 0x14a   : > { %v1490_v23 = vpop.f32.mrb[43].mxu0 }
 0x14d   : > { %v970_v24 = vpop.f32.mrb[44].mxu1 }
 0x14e   : > { %v992_v25 = vadd.f32 %v970_v24, %v896_v59  ;;  %v1475_v26 = vpop.f32.mrb[45].mxu1 }
 0x14f   : > { %v973_v6 = vpop.f32.mrb[46].mxu1  ;;  %v1063_v9 = vpop.f32.mrb[44].mxu0 }
 0x150   : > { %v1077_v28 = vadd.f32 %v1055_v18, %v992_v25  ;;  %v993_v29 = vadd.f32 %v973_v6, %v897_v62  ;;  %v1476_v30 = vpop.f32.mrb[47].mxu1  ;;  %v1493_v31 = vpop.f32.mrb[45].mxu0 }
 0x151   : > { %v1066_v32 = vpop.f32.mrb[46].mxu0 }
 0x152   : > { %v1089_v33 = vadd.f32 %v1323_v27, %v1077_v28  ;;  %v1078_v34 = vadd.f32 %v1058_v22, %v993_v29  ;;  %v1494_v36 = vpop.f32.mrb[47].mxu0 }
 0x154   : > { %v1100_v38 = vmin.f32 %v1089_v33, 0.0  ;;  %v1090_v39 = vadd.f32 %v1323_v27, %v1078_v34  ;;  %v1094_v41 = vmax.f32 %v1089_v33, 0.0 }
 0x155   : > { %v978_v40 = vpop.f32.mrb[48].mxu1 }
 0x156   : > { %v1111_v43 = vmul.f32 %v1324_v37, %v1100_v38  ;;  %v1101_v44 = vmin.f32 %v1090_v39, 0.0  ;;  %v994_v45 = vadd.f32 %v978_v40, %v898_v11  ;;  %v1479_v0 = vpop.f32.mrb[49].mxu1  ;;  %v1095_v46 = vmax.f32 %v1090_v39, 0.0 }
 0x157   : > { %v981_v35 = vpop.f32.mrb[50].mxu1  ;;  %v1071_v47 = vpop.f32.mrb[48].mxu0 }
 0x158   : > { %v1116_v42 = vadd.f32 %v1111_v43, %v1094_v41  ;;  %v1112_v48 = vmul.f32 %v1324_v37, %v1101_v44  ;;  %v1079_v49 = vadd.f32 %v1063_v9, %v994_v45  ;;  %v995_v50 = vadd.f32 %v981_v35, %v899_v14  ;;  %v1480_v51 = vpop.f32.mrb[51].mxu1  ;;  %v1497_v52 = vpop.f32.mrb[49].mxu0 }
 0x159   : > { %v1074_v53 = vpop.f32.mrb[50].mxu0 }
 0x15a   : > { %v1332_v54 = vpack.c.bf16 %v1116_v42, %v1116_v42  ;;  %v1117_v55 = vadd.f32 %v1112_v48, %v1095_v46  ;;  %v1091_v56 = vadd.f32 %v1323_v27, %v1079_v49  ;;  %v1080_v57 = vadd.f32 %v1066_v32, %v995_v50  ;;  %v1498_v58 = vpop.f32.mrb[51].mxu0 }
 0x15c   : > { %1143 = vst.msk [vmem:[%s1899_s22] sm:$0xf] %vm1142_vm8, %v1332_v54  ;;  %v1333_v59 = vpack.c.bf16 %v1117_v55, %v1117_v55  ;;  %v1102_v60 = vmin.f32 %v1091_v56, 0.0  ;;  %v1092_v61 = vadd.f32 %v1323_v27, %v1080_v57  ;;  %v1096_v63 = vmax.f32 %v1091_v56, 0.0 }
 0x15d   : > { %v986_v62 = vpop.f32.mrb[52].mxu1 }
 0x15e   : > { %1144 = vst.msk [vmem:[%s1899_s22 + $0x4] sm:$0xf] %vm1142_vm8, %v1333_v59  ;;  %v1113_v1 = vmul.f32 %v1324_v37, %v1102_v60  ;;  %v1103_v2 = vmin.f32 %v1092_v61, 0.0  ;;  %v996_v3 = vadd.f32 %v986_v62, %v900_v21  ;;  %v1483_v7 = vpop.f32.mrb[53].mxu1  ;;  %v1097_v5 = vmax.f32 %v1092_v61, 0.0 }
 0x15f   : > { %v989_v8 = vpop.f32.mrb[54].mxu1 }
 0x160   : > { %v1118_v10 = vadd.f32 %v1113_v1, %v1096_v63  ;;  %v1114_v11 = vmul.f32 %v1324_v37, %v1103_v2  ;;  %v1081_v12 = vadd.f32 %v1071_v47, %v996_v3  ;;  %v1484_v13 = vpop.f32.mrb[55].mxu1 }
 0x162   : > { %v1334_v14 = vpack.c.bf16 %v1118_v10, %v1118_v10  ;;  %v1119_v15 = vadd.f32 %v1114_v11, %v1097_v5  ;;  %v1093_v16 = vadd.f32 %v1323_v27, %v1081_v12 }
 0x164   : > { %1145 = vst.msk [vmem:[%s1899_s22 + $0x8] sm:$0xf] %vm1142_vm8, %v1334_v14  ;;  %v1335_v4 = vpack.c.bf16 %v1119_v15, %v1119_v15  ;;  %v1104_v17 = vmin.f32 %v1093_v16, 0.0  ;;  %v1098_v18 = vmax.f32 %v1093_v16, 0.0 }
 0x166   : > { %1146 = vst.msk [vmem:[%s1899_s22 + $0xc] sm:$0xf] %vm1142_vm8, %v1335_v4  ;;  %v1115_v19 = vmul.f32 %v1324_v37, %v1104_v17 }
 0x168   : > { %v1120_v20 = vadd.f32 %v1115_v19, %v1098_v18 }
 0x16a   : > { %v1336_v21 = vpack.c.bf16 %v1120_v20, %v1120_v20 }
 0x16c   : > { %1147 = vst.msk [vmem:[%s1899_s22 + $0x10] sm:$0xf] %vm1142_vm8, %v1336_v21 }
 0x16d PF: > { %s14_s19 = sadd.s32 1, %s1603_s19   ;;  %s1931_s15 = smov %s1595_s17 }
 0x16e   : > { %p11_p7 = scmp.ge.s32.totalorder %s14_s19, 6   ;;  %s1932_s16 = smov %s1599_s18 }
 0x16f   : > { %s1933_s17 = smov %s1936_s20  ;;  %s1934_s18 = smov %s1940_s21 }
 0x170   :  { %13 = sbr.rel (!%p11_p7) target bundleno = 3 (0x3), region = 77 }

</bundles_post_ra>
